<compile_context>
chip_gen: v5e
topology: v5e:2x2
jax: 0.10.0
libtpu: 0.0.40
codegen_flags: <defaults>
</compile_context>

<pallas_src>
import math

import jax
import jax.numpy as jnp
from jax import lax
from jax.experimental import pallas as pl
from jax.experimental.pallas import tpu as pltpu


def _gelu(y):
    # TODO(synk): PyTorch nn.GELU() default is the exact erf formulation; Mosaic
    # has no reliable erf lowering, so the tanh approximation is used
    # (max abs deviation ~1e-3 vs erf-GELU).
    c = jnp.float32(math.sqrt(2.0 / math.pi))
    return 0.5 * y * (1.0 + jnp.tanh(c * (y + jnp.float32(0.044715) * y * y * y)))


# ----------------------------- Pallas kernel ------------------------------- #

def _build_up_kernel(n, h, w, cin, mid, cout):
    """Fused (bilinear x2 -> conv3x3+BN+GELU -> conv3x3+BN+GELU) kernel.

    Activations live as lane-dense 2-D slabs (rows, width*channels); the whole
    batch is folded into the row (matmul M) dimension.  Zero padding and row
    shifts live in the precomputed matmul operators, so the body is matmuls +
    bias add + GELU only: no reshapes, concats or relayouts.
    """
    oh, ow = 2 * h, 2 * w
    bf16, f32 = jnp.bfloat16, jnp.float32

    def kernel(x_ref, mw_ref, uh_ref, w1_ref, b1_ref, sdn_ref, sup_ref,
               w2_ref, b2_ref, o_ref):
        # x_ref  : (N*H, W*Cin)              bf16  batch as one HWC slab
        # mw_ref : (W*Cin, (OW+2)*Cin)       bf16  W-axis interp, W-zero-padded output
        # uh_ref : (3, N*OH, N*H)            bf16  H-axis interp per conv1 row tap
        #                                          (block-diag over batch, zero pad rows)
        # w1_ref : (3, (OW+2)*Cin, (OW+2)*Mid) bf16 banded conv1 weights (BN folded)
        # b1_ref : (1, (OW+2)*Mid)           f32   conv1 bias (zero at W border)
        # sdn/sup: (N*OH, N*OH)              bf16  per-image row shifts (conv2 H pad)
        # w2_ref : (3, (OW+2)*Mid, OW*Cout)  bf16  banded conv2 weights (BN folded)
        # b2_ref : (1, OW*Cout)              f32   conv2 bias
        # o_ref  : (N*OH, OW*Cout)           f32   lane-dense output slab

        # W-axis bilinear upsample (zero W-border columns are built into mw).
        xw = jnp.dot(x_ref[...], mw_ref[...], preferred_element_type=f32)
        xwb = xw.astype(bf16)                                   # (N*H, (OW+2)*Cin)

        # conv1 fused with the H-axis upsample: the conv's W/channel contraction
        # runs at H rows (banded matmul), then the row-tap-shifted H-interp
        # operator expands to OH rows and sums the three taps.
        acc1 = None
        for kh in range(3):
            t = jnp.dot(xwb, w1_ref[kh], preferred_element_type=f32)   # (N*H, (OW+2)*Mid)
            term = jnp.dot(uh_ref[kh], t.astype(bf16),
                           preferred_element_type=f32)                 # (N*OH, (OW+2)*Mid)
            acc1 = term if acc1 is None else acc1 + term
        h1 = _gelu(acc1 + b1_ref[...])       # W-border cols stay exactly 0 (GELU(0)=0)
        h1b = h1.astype(bf16)

        # conv2: row taps via block-diagonal 0/1 shift operators (their bf16
        # cast is exact -- pure row shuffles), W taps via banded weights.
        t0 = jnp.dot(sdn_ref[...], h1b, preferred_element_type=f32).astype(bf16)
        t2 = jnp.dot(sup_ref[...], h1b, preferred_element_type=f32).astype(bf16)
        acc2 = (jnp.dot(t0, w2_ref[0], preferred_element_type=f32)
                + jnp.dot(h1b, w2_ref[1], preferred_element_type=f32)
                + jnp.dot(t2, w2_ref[2], preferred_element_type=f32))
        o_ref[...] = _gelu(acc2 + b2_ref[...])                  # (N*OH, OW*Cout)

    return kernel


# ------------------------------- JAX glue ----------------------------------- #

def _interp_matrix(in_size, out_size):
    """(out_size, in_size) matrix for 1-D linear interpolation, align_corners=True."""
    if in_size == 1:
        return jnp.ones((out_size, in_size), jnp.float32)
    scale = (in_size - 1) / (out_size - 1)
    src = jnp.arange(out_size, dtype=jnp.float32) * jnp.float32(scale)
    lo = jnp.clip(jnp.floor(src).astype(jnp.int32), 0, in_size - 1)
    hi = jnp.clip(lo + 1, 0, in_size - 1)
    frac = src - lo.astype(jnp.float32)
    m_lo = jax.nn.one_hot(lo, in_size, dtype=jnp.float32) * (1.0 - frac)[:, None]
    m_hi = jax.nn.one_hot(hi, in_size, dtype=jnp.float32) * frac[:, None]
    return m_lo + m_hi


def _fold_bn(gamma, beta, mean, var, eps=1e-5):
    s = gamma / jnp.sqrt(var + eps)
    return s, beta - mean * s


def _shift_select(ow, kw, pad_out):
    """(OW+2, OW+2*pad_out) 0/1 matrix: padded input col (ow_+kw) -> output col (ow_+pad_out)."""
    m = jnp.zeros((ow + 2, ow + 2 * pad_out), jnp.float32)
    return m.at[jnp.arange(ow) + kw, jnp.arange(ow) + pad_out].set(1.0)


def _banded_conv_ops(w_hwio, ow, pad_out):
    """Per-row-tap banded weight operators for a 3x3 'same' conv on W*C slabs.

    w_hwio: (3, 3, Cin, Cout).  Returns (3, (OW+2)*Cin, (OW+2*pad_out)*Cout):
    operator kh maps one W-zero-padded input row slab to one output row slab;
    with pad_out=1 the output keeps zero border columns so it can feed the next
    conv without re-padding.
    """
    ops = []
    for kh in range(3):
        taps = [jnp.kron(_shift_select(ow, kw, pad_out), w_hwio[kh, kw])
                for kw in range(3)]
        ops.append(taps[0] + taps[1] + taps[2])
    return jnp.stack(ops)


def up_forward_pallas(x_nchw, params):
    """Forward pass of `Up` (use_upsample=True).  NCHW in / NCHW out.

    BatchNorm is folded in eval mode (running statistics), matching the common
    inference deployment of this module.
    """
    n, cin, h, w = x_nchw.shape
    oh, ow = 2 * h, 2 * w
    mid = params["w1"].shape[-1]
    cout = params["w2"].shape[-1]
    bf16 = jnp.bfloat16

    # Layout glue only on the small pre-upsample tensor: NCHW -> one (N*H, W*Cin) slab.
    xs = jnp.transpose(x_nchw, (0, 2, 3, 1)).reshape(n * h, w * cin).astype(bf16)

    # Bilinear x2 (align_corners=True) as matmul operators.
    #   mw: W-axis interp kron'd with I_Cin and zero-padded by Cin cols per side,
    #       so its output is already the W-zero-padded conv1 input.
    #   uh: H-axis interp with a zero row above/below; its 3 row-tap windows fold
    #       conv1's H padding/row shifts (and the H upsample itself) into conv1.
    #       kron with I_N keeps images independent with batch folded into M.
    uw = _interp_matrix(w, ow)                                     # (OW, W)
    uh = _interp_matrix(h, oh)                                     # (OH, H)
    mw = jnp.pad(jnp.kron(uw.T, jnp.eye(cin, dtype=jnp.float32)),
                 ((0, 0), (cin, cin)))                             # (W*Cin, (OW+2)*Cin)
    uh_pad = jnp.pad(uh, ((1, 1), (0, 0)))                         # (OH+2, H)
    eye_n = jnp.eye(n, dtype=jnp.float32)
    uh_ops = jnp.stack([jnp.kron(eye_n, uh_pad[kh:kh + oh]) for kh in range(3)])

    # Per-image row-shift operators (conv2's top/bottom zero padding).
    shift_dn = jnp.kron(eye_n, jnp.eye(oh, k=-1, dtype=jnp.float32))  # row r <- r-1
    shift_up = jnp.kron(eye_n, jnp.eye(oh, k=1, dtype=jnp.float32))   # row r <- r+1

    # Fold BN (eval) scale into the banded conv weights; tile biases lane-dense.
    sc1, bi1 = _fold_bn(params["gamma1"], params["beta1"], params["mean1"], params["var1"])
    sc2, bi2 = _fold_bn(params["gamma2"], params["beta2"], params["mean2"], params["var2"])
    w1_ops = _banded_conv_ops(params["w1"] * sc1, ow, pad_out=1)   # (3,(OW+2)Cin,(OW+2)Mid)
    w2_ops = _banded_conv_ops(params["w2"] * sc2, ow, pad_out=0)   # (3,(OW+2)Mid,OW*Cout)
    b1s = jnp.concatenate([jnp.zeros((mid,), jnp.float32), jnp.tile(bi1, ow),
                           jnp.zeros((mid,), jnp.float32)]).reshape(1, (ow + 2) * mid)
    b1s = b1s.astype(jnp.float32)
    b2s = jnp.tile(bi2, ow).reshape(1, ow * cout).astype(jnp.float32)

    args = (xs, mw.astype(bf16), uh_ops.astype(bf16), w1_ops.astype(bf16), b1s,
            shift_dn.astype(bf16), shift_up.astype(bf16), w2_ops.astype(bf16), b2s)

    # Advisory cost estimate (review item): matmul flops, one tanh per GELU elem.
    flops = (2 * (n * h) * (w * cin) * ((ow + 2) * cin)
             + 3 * 2 * (n * h) * ((ow + 2) * cin) * ((ow + 2) * mid)
             + 3 * 2 * (n * oh) * (n * h) * ((ow + 2) * mid)
             + 2 * 2 * (n * oh) * (n * oh) * ((ow + 2) * mid)
             + 3 * 2 * (n * oh) * ((ow + 2) * mid) * (ow * cout))
    transcendentals = (n * oh) * ((ow + 2) * mid + ow * cout)
    bytes_accessed = (sum(a.size * a.dtype.itemsize for a in args)
                      + (n * oh) * (ow * cout) * 4)

    kernel = _build_up_kernel(n, h, w, cin, mid, cout)

    # TODO(synk): at real U-Net sizes, (a) add halo-tiled H blocking as a
    # 'parallel' grid axis (also gives v7x's two TensorCores work) with
    # vmem_limit_bytes re-derived for the tile, and (b) replace the
    # kron-structured W-interp / banded-weight operators (quadratic in OW*C)
    # with a 4-phase subpixel-conv formulation; both only matter well beyond
    # these test shapes.
    out_slab = pl.pallas_call(
        kernel,
        out_shape=jax.ShapeDtypeStruct((n * oh, ow * cout), jnp.float32),
        grid=(1,),
        in_specs=[
            pl.BlockSpec((n * h, w * cin), lambda i: (0, 0)),                  # x slab
            pl.BlockSpec((w * cin, (ow + 2) * cin), lambda i: (0, 0)),         # mw
            pl.BlockSpec((3, n * oh, n * h), lambda i: (0, 0, 0)),             # uh taps
            pl.BlockSpec((3, (ow + 2) * cin, (ow + 2) * mid), lambda i: (0, 0, 0)),  # w1
            pl.BlockSpec((1, (ow + 2) * mid), lambda i: (0, 0)),               # b1
            pl.BlockSpec((n * oh, n * oh), lambda i: (0, 0)),                  # shift_dn
            pl.BlockSpec((n * oh, n * oh), lambda i: (0, 0)),                  # shift_up
            pl.BlockSpec((3, (ow + 2) * mid, ow * cout), lambda i: (0, 0, 0)), # w2
            pl.BlockSpec((1, ow * cout), lambda i: (0, 0)),                    # b2
        ],
        out_specs=pl.BlockSpec((n * oh, ow * cout), lambda i: (0, 0)),
        compiler_params=pltpu.CompilerParams(
            dimension_semantics=("arbitrary",),
            vmem_limit_bytes=32 * 1024 * 1024),
        cost_estimate=pl.CostEstimate(
            flops=int(flops), transcendentals=int(transcendentals),
            bytes_accessed=int(bytes_accessed)),
    )(*args)

    # lane-dense slab (N*OH, OW*Cout) -> NCHW
    return jnp.transpose(out_slab.reshape(n, oh, ow, cout), (0, 3, 1, 2))


# ----------------- Pure-JAX reference (numerical sanity check) -------------- #

def _bilinear_upsample_x2_ref(x):
    """nn.Upsample(scale_factor=2, mode='bilinear', align_corners=True), NHWC."""
    n, h, w, c = x.shape
    oh, ow = 2 * h, 2 * w

    def coords(in_size, out_size):
        if in_size == 1:
            zi = jnp.zeros((out_size,), jnp.int32)
            return jnp.zeros((out_size,), jnp.float32), zi, zi
        scale = (in_size - 1) / (out_size - 1)
        src = jnp.arange(out_size, dtype=jnp.float32) * jnp.float32(scale)
        lo = jnp.clip(jnp.floor(src).astype(jnp.int32), 0, in_size - 1)
        hi = jnp.clip(lo + 1, 0, in_size - 1)
        return src - lo.astype(jnp.float32), lo, hi

    fh, hlo, hhi = coords(h, oh)
    fw, wlo, whi = coords(w, ow)
    top, bot = x[:, hlo], x[:, hhi]
    xh = top * (1.0 - fh)[None, :, None, None] + bot * fh[None, :, None, None]
    left, right = xh[:, :, wlo], xh[:, :, whi]
    return left * (1.0 - fw)[None, None, :, None] + right * fw[None, None, :, None]


def up_forward_ref(x_nchw, params):
    """Reference with bf16-rounded conv operands (like the Pallas kernel)."""
    x = jnp.transpose(x_nchw, (0, 2, 3, 1)).astype(jnp.float32)
    x = _bilinear_upsample_x2_ref(x)

    def conv_bn_gelu(x, w_hwio, gamma, beta, mean, var):
        s, b = _fold_bn(gamma, beta, mean, var)
        xr = x.astype(jnp.bfloat16).astype(jnp.float32)
        wr = (w_hwio * s).astype(jnp.bfloat16).astype(jnp.float32)
        y = lax.conv_general_dilated(
            xr, wr, window_strides=(1, 1), padding="SAME",
            dimension_numbers=("NHWC", "HWIO", "NHWC"),
            precision=lax.Precision.HIGHEST)
        return _gelu(y + b[None, None, None, :])

    x = conv_bn_gelu(x, params["w1"], params["gamma1"], params["beta1"],
                     params["mean1"], params["var1"])
    x = conv_bn_gelu(x, params["w2"], params["gamma2"], params["beta2"],
                     params["mean2"], params["var2"])
    return jnp.transpose(x, (0, 3, 1, 2))


def init_params(key, in_channels, out_channels):
    mid = in_channels // 2
    if mid == 0:
        raise ValueError("Up(in_channels=1) gives mid_channels=0 (degenerate DoubleConv).")
    ks = jax.random.split(key, 10)

    def conv_w(k, cin, cout):  # kaiming-ish, HWIO
        return jax.random.normal(k, (3, 3, cin, cout), jnp.float32) / jnp.sqrt(9.0 * cin)

    return {
        "w1": conv_w(ks[0], in_channels, mid),
        "gamma1": 1.0 + 0.1 * jax.random.normal(ks[1], (mid,), jnp.float32),
        "beta1": 0.1 * jax.random.normal(ks[2], (mid,), jnp.float32),
        "mean1": 0.05 * jax.random.normal(ks[3], (mid,), jnp.float32),
        "var1": 1.0 + 0.1 * jax.random.uniform(ks[4], (mid,), jnp.float32),
        "w2": conv_w(ks[5], mid, out_channels),
        "gamma2": 1.0 + 0.1 * jax.random.normal(ks[6], (out_channels,), jnp.float32),
        "beta2": 0.1 * jax.random.normal(ks[7], (out_channels,), jnp.float32),
        "mean2": 0.05 * jax.random.normal(ks[8], (out_channels,), jnp.float32),
        "var2": 1.0 + 0.1 * jax.random.uniform(ks[9], (out_channels,), jnp.float32),
    }


if __name__ == "__main__":
    key = jax.random.PRNGKey(0)
    kx, kp = jax.random.split(key)

    # Up(in_channels=4, out_channels=8); 16x16 input -> output (2, 8, 32, 32)
    N, CIN, H, W = 2, 4, 16, 16
    COUT = 8
    x = jax.random.normal(kx, (N, CIN, H, W), jnp.float32)
    params = init_params(kp, CIN, COUT)

    up_fn = jax.jit(up_forward_pallas)
    out = jax.block_until_ready(up_fn(x, params))
    assert out.shape == (N, COUT, 2 * H, 2 * W), out.shape

    ref = up_forward_ref(x, params)
    max_err = float(jnp.max(jnp.abs(out - ref)))
    # bf16 matmul operands at several stages (input slab, interp operators,
    # banded weights, inter-stage activations) with f32 accumulation, vs. a
    # reference that only rounds the conv operands: agreement within ~1e-2;
    # 2e-2 tolerance leaves slack for rounding-boundary flips.
    assert jnp.allclose(out, ref, rtol=2e-2, atol=2e-2), max_err

    print("KERNEL_OK")
</pallas_src>

<mosaic_0001>
module attributes {stable_mosaic.version = 11 : i64} {
  func.func @kernel(%arg0: i32, %arg1: memref<32x64xbf16, #tpu.memory_space<vmem>>, %arg2: memref<64x136xbf16, #tpu.memory_space<vmem>>, %arg3: memref<3x64x32xbf16, #tpu.memory_space<vmem>>, %arg4: memref<3x136x68xbf16, #tpu.memory_space<vmem>>, %arg5: memref<1x68xf32, #tpu.memory_space<vmem>>, %arg6: memref<64x64xbf16, #tpu.memory_space<vmem>>, %arg7: memref<64x64xbf16, #tpu.memory_space<vmem>>, %arg8: memref<3x68x256xbf16, #tpu.memory_space<vmem>>, %arg9: memref<1x256xf32, #tpu.memory_space<vmem>>, %arg10: memref<64x256xf32, #tpu.memory_space<vmem>>) attributes {dimension_semantics = [#tpu.dimension_semantics<arbitrary>], iteration_bounds = array<i64: 1>, scalar_prefetch = 0 : i64, scratch_operands = 0 : i64, tpu.core_type = #tpu.core_type<tc>, window_params = [{pipeline_mode = #tpu.pipeline_mode<synchronous>, transform_indices = @transform_0, window_bounds = array<i64: 32, 64>}, {pipeline_mode = #tpu.pipeline_mode<synchronous>, transform_indices = @transform_1, window_bounds = array<i64: 64, 136>}, {pipeline_mode = #tpu.pipeline_mode<synchronous>, transform_indices = @transform_2, window_bounds = array<i64: 3, 64, 32>}, {pipeline_mode = #tpu.pipeline_mode<synchronous>, transform_indices = @transform_3, window_bounds = array<i64: 3, 136, 68>}, {pipeline_mode = #tpu.pipeline_mode<synchronous>, transform_indices = @transform_4, window_bounds = array<i64: 1, 68>}, {pipeline_mode = #tpu.pipeline_mode<synchronous>, transform_indices = @transform_5, window_bounds = array<i64: 64, 64>}, {pipeline_mode = #tpu.pipeline_mode<synchronous>, transform_indices = @transform_6, window_bounds = array<i64: 64, 64>}, {pipeline_mode = #tpu.pipeline_mode<synchronous>, transform_indices = @transform_7, window_bounds = array<i64: 3, 68, 256>}, {pipeline_mode = #tpu.pipeline_mode<synchronous>, transform_indices = @transform_8, window_bounds = array<i64: 1, 256>}, {pipeline_mode = #tpu.pipeline_mode<synchronous>, transform_indices = @transform_9, window_bounds = array<i64: 64, 256>}]} {
    %c0 = arith.constant 0 : index
    %c0_0 = arith.constant 0 : index
    %0 = vector.load %arg1[%c0, %c0_0] : memref<32x64xbf16, #tpu.memory_space<vmem>>, vector<32x64xbf16>
    %c0_1 = arith.constant 0 : index
    %c0_2 = arith.constant 0 : index
    %1 = vector.load %arg2[%c0_1, %c0_2] : memref<64x136xbf16, #tpu.memory_space<vmem>>, vector<64x136xbf16>
    %cst = arith.constant dense<0.000000e+00> : vector<32x136xf32>
    %2 = tpu.matmul %0, %1, %cst {dimension_numbers = #tpu.dot_dimension_numbers<[1], [0], [0], [1], [0, 0, 1, 1], [], []>} : vector<32x64xbf16>, vector<64x136xbf16>, vector<32x136xf32> -> vector<32x136xf32>
    %3 = arith.truncf %2 : vector<32x136xf32> to vector<32x136xbf16>
    %c0_3 = arith.constant 0 : index
    %c0_4 = arith.constant 0 : index
    %c0_5 = arith.constant 0 : index
    %4 = vector.load %arg4[%c0_3, %c0_4, %c0_5] : memref<3x136x68xbf16, #tpu.memory_space<vmem>>, vector<1x136x68xbf16>
    %5 = vector.shape_cast %4 : vector<1x136x68xbf16> to vector<136x68xbf16>
    %cst_6 = arith.constant dense<0.000000e+00> : vector<32x68xf32>
    %6 = tpu.matmul %3, %5, %cst_6 {dimension_numbers = #tpu.dot_dimension_numbers<[1], [0], [0], [1], [0, 0, 1, 1], [], []>} : vector<32x136xbf16>, vector<136x68xbf16>, vector<32x68xf32> -> vector<32x68xf32>
    %c0_7 = arith.constant 0 : index
    %c0_8 = arith.constant 0 : index
    %c0_9 = arith.constant 0 : index
    %7 = vector.load %arg3[%c0_7, %c0_8, %c0_9] : memref<3x64x32xbf16, #tpu.memory_space<vmem>>, vector<1x64x32xbf16>
    %8 = vector.shape_cast %7 : vector<1x64x32xbf16> to vector<64x32xbf16>
    %9 = arith.truncf %6 : vector<32x68xf32> to vector<32x68xbf16>
    %cst_10 = arith.constant dense<0.000000e+00> : vector<64x68xf32>
    %10 = tpu.matmul %8, %9, %cst_10 {dimension_numbers = #tpu.dot_dimension_numbers<[1], [0], [0], [1], [0, 0, 1, 1], [], []>} : vector<64x32xbf16>, vector<32x68xbf16>, vector<64x68xf32> -> vector<64x68xf32>
    %c1 = arith.constant 1 : index
    %c0_11 = arith.constant 0 : index
    %c0_12 = arith.constant 0 : index
    %11 = vector.load %arg4[%c1, %c0_11, %c0_12] : memref<3x136x68xbf16, #tpu.memory_space<vmem>>, vector<1x136x68xbf16>
    %12 = vector.shape_cast %11 : vector<1x136x68xbf16> to vector<136x68xbf16>
    %cst_13 = arith.constant dense<0.000000e+00> : vector<32x68xf32>
    %13 = tpu.matmul %3, %12, %cst_13 {dimension_numbers = #tpu.dot_dimension_numbers<[1], [0], [0], [1], [0, 0, 1, 1], [], []>} : vector<32x136xbf16>, vector<136x68xbf16>, vector<32x68xf32> -> vector<32x68xf32>
    %c1_14 = arith.constant 1 : index
    %c0_15 = arith.constant 0 : index
    %c0_16 = arith.constant 0 : index
    %14 = vector.load %arg3[%c1_14, %c0_15, %c0_16] : memref<3x64x32xbf16, #tpu.memory_space<vmem>>, vector<1x64x32xbf16>
    %15 = vector.shape_cast %14 : vector<1x64x32xbf16> to vector<64x32xbf16>
    %16 = arith.truncf %13 : vector<32x68xf32> to vector<32x68xbf16>
    %cst_17 = arith.constant dense<0.000000e+00> : vector<64x68xf32>
    %17 = tpu.matmul %15, %16, %cst_17 {dimension_numbers = #tpu.dot_dimension_numbers<[1], [0], [0], [1], [0, 0, 1, 1], [], []>} : vector<64x32xbf16>, vector<32x68xbf16>, vector<64x68xf32> -> vector<64x68xf32>
    %18 = arith.addf %10, %17 : vector<64x68xf32>
    %c2 = arith.constant 2 : index
    %c0_18 = arith.constant 0 : index
    %c0_19 = arith.constant 0 : index
    %19 = vector.load %arg4[%c2, %c0_18, %c0_19] : memref<3x136x68xbf16, #tpu.memory_space<vmem>>, vector<1x136x68xbf16>
    %20 = vector.shape_cast %19 : vector<1x136x68xbf16> to vector<136x68xbf16>
    %cst_20 = arith.constant dense<0.000000e+00> : vector<32x68xf32>
    %21 = tpu.matmul %3, %20, %cst_20 {dimension_numbers = #tpu.dot_dimension_numbers<[1], [0], [0], [1], [0, 0, 1, 1], [], []>} : vector<32x136xbf16>, vector<136x68xbf16>, vector<32x68xf32> -> vector<32x68xf32>
    %c2_21 = arith.constant 2 : index
    %c0_22 = arith.constant 0 : index
    %c0_23 = arith.constant 0 : index
    %22 = vector.load %arg3[%c2_21, %c0_22, %c0_23] : memref<3x64x32xbf16, #tpu.memory_space<vmem>>, vector<1x64x32xbf16>
    %23 = vector.shape_cast %22 : vector<1x64x32xbf16> to vector<64x32xbf16>
    %24 = arith.truncf %21 : vector<32x68xf32> to vector<32x68xbf16>
    %cst_24 = arith.constant dense<0.000000e+00> : vector<64x68xf32>
    %25 = tpu.matmul %23, %24, %cst_24 {dimension_numbers = #tpu.dot_dimension_numbers<[1], [0], [0], [1], [0, 0, 1, 1], [], []>} : vector<64x32xbf16>, vector<32x68xbf16>, vector<64x68xf32> -> vector<64x68xf32>
    %26 = arith.addf %18, %25 : vector<64x68xf32>
    %c0_25 = arith.constant 0 : index
    %c0_26 = arith.constant 0 : index
    %27 = vector.load %arg5[%c0_25, %c0_26] : memref<1x68xf32, #tpu.memory_space<vmem>>, vector<1x68xf32>
    %28 = vector.broadcast %27 : vector<1x68xf32> to vector<64x68xf32>
    %29 = arith.addf %26, %28 : vector<64x68xf32>
    %cst_27 = arith.constant 5.000000e-01 : f32
    %30 = vector.broadcast %cst_27 : f32 to vector<64x68xf32>
    %31 = arith.mulf %30, %29 : vector<64x68xf32>
    %cst_28 = arith.constant 4.471500e-02 : f32
    %32 = vector.broadcast %cst_28 : f32 to vector<64x68xf32>
    %33 = arith.mulf %32, %29 : vector<64x68xf32>
    %34 = arith.mulf %33, %29 : vector<64x68xf32>
    %35 = arith.mulf %34, %29 : vector<64x68xf32>
    %36 = arith.addf %29, %35 : vector<64x68xf32>
    %cst_29 = arith.constant 0.797884583 : f32
    %37 = vector.broadcast %cst_29 : f32 to vector<64x68xf32>
    %38 = arith.mulf %37, %36 : vector<64x68xf32>
    %39 = math.tanh %38 : vector<64x68xf32>
    %cst_30 = arith.constant 1.000000e+00 : f32
    %40 = vector.broadcast %cst_30 : f32 to vector<64x68xf32>
    %41 = arith.addf %40, %39 : vector<64x68xf32>
    %42 = arith.mulf %31, %41 : vector<64x68xf32>
    %43 = arith.truncf %42 : vector<64x68xf32> to vector<64x68xbf16>
    %c0_31 = arith.constant 0 : index
    %c0_32 = arith.constant 0 : index
    %44 = vector.load %arg6[%c0_31, %c0_32] : memref<64x64xbf16, #tpu.memory_space<vmem>>, vector<64x64xbf16>
    %cst_33 = arith.constant dense<0.000000e+00> : vector<64x68xf32>
    %45 = tpu.matmul %44, %43, %cst_33 {dimension_numbers = #tpu.dot_dimension_numbers<[1], [0], [0], [1], [0, 0, 1, 1], [], []>} : vector<64x64xbf16>, vector<64x68xbf16>, vector<64x68xf32> -> vector<64x68xf32>
    %46 = arith.truncf %45 : vector<64x68xf32> to vector<64x68xbf16>
    %c0_34 = arith.constant 0 : index
    %c0_35 = arith.constant 0 : index
    %47 = vector.load %arg7[%c0_34, %c0_35] : memref<64x64xbf16, #tpu.memory_space<vmem>>, vector<64x64xbf16>
    %cst_36 = arith.constant dense<0.000000e+00> : vector<64x68xf32>
    %48 = tpu.matmul %47, %43, %cst_36 {dimension_numbers = #tpu.dot_dimension_numbers<[1], [0], [0], [1], [0, 0, 1, 1], [], []>} : vector<64x64xbf16>, vector<64x68xbf16>, vector<64x68xf32> -> vector<64x68xf32>
    %49 = arith.truncf %48 : vector<64x68xf32> to vector<64x68xbf16>
    %c0_37 = arith.constant 0 : index
    %c0_38 = arith.constant 0 : index
    %c0_39 = arith.constant 0 : index
    %50 = vector.load %arg8[%c0_37, %c0_38, %c0_39] : memref<3x68x256xbf16, #tpu.memory_space<vmem>>, vector<1x68x256xbf16>
    %51 = vector.shape_cast %50 : vector<1x68x256xbf16> to vector<68x256xbf16>
    %cst_40 = arith.constant dense<0.000000e+00> : vector<64x256xf32>
    %52 = tpu.matmul %46, %51, %cst_40 {dimension_numbers = #tpu.dot_dimension_numbers<[1], [0], [0], [1], [0, 0, 1, 1], [], []>} : vector<64x68xbf16>, vector<68x256xbf16>, vector<64x256xf32> -> vector<64x256xf32>
    %c1_41 = arith.constant 1 : index
    %c0_42 = arith.constant 0 : index
    %c0_43 = arith.constant 0 : index
    %53 = vector.load %arg8[%c1_41, %c0_42, %c0_43] : memref<3x68x256xbf16, #tpu.memory_space<vmem>>, vector<1x68x256xbf16>
    %54 = vector.shape_cast %53 : vector<1x68x256xbf16> to vector<68x256xbf16>
    %cst_44 = arith.constant dense<0.000000e+00> : vector<64x256xf32>
    %55 = tpu.matmul %43, %54, %cst_44 {dimension_numbers = #tpu.dot_dimension_numbers<[1], [0], [0], [1], [0, 0, 1, 1], [], []>} : vector<64x68xbf16>, vector<68x256xbf16>, vector<64x256xf32> -> vector<64x256xf32>
    %56 = arith.addf %52, %55 : vector<64x256xf32>
    %c2_45 = arith.constant 2 : index
    %c0_46 = arith.constant 0 : index
    %c0_47 = arith.constant 0 : index
    %57 = vector.load %arg8[%c2_45, %c0_46, %c0_47] : memref<3x68x256xbf16, #tpu.memory_space<vmem>>, vector<1x68x256xbf16>
    %58 = vector.shape_cast %57 : vector<1x68x256xbf16> to vector<68x256xbf16>
    %cst_48 = arith.constant dense<0.000000e+00> : vector<64x256xf32>
    %59 = tpu.matmul %49, %58, %cst_48 {dimension_numbers = #tpu.dot_dimension_numbers<[1], [0], [0], [1], [0, 0, 1, 1], [], []>} : vector<64x68xbf16>, vector<68x256xbf16>, vector<64x256xf32> -> vector<64x256xf32>
    %60 = arith.addf %56, %59 : vector<64x256xf32>
    %c0_49 = arith.constant 0 : index
    %c0_50 = arith.constant 0 : index
    %61 = vector.load %arg9[%c0_49, %c0_50] : memref<1x256xf32, #tpu.memory_space<vmem>>, vector<1x256xf32>
    %62 = vector.broadcast %61 : vector<1x256xf32> to vector<64x256xf32>
    %63 = arith.addf %60, %62 : vector<64x256xf32>
    %cst_51 = arith.constant 5.000000e-01 : f32
    %64 = vector.broadcast %cst_51 : f32 to vector<64x256xf32>
    %65 = arith.mulf %64, %63 : vector<64x256xf32>
    %cst_52 = arith.constant 4.471500e-02 : f32
    %66 = vector.broadcast %cst_52 : f32 to vector<64x256xf32>
    %67 = arith.mulf %66, %63 : vector<64x256xf32>
    %68 = arith.mulf %67, %63 : vector<64x256xf32>
    %69 = arith.mulf %68, %63 : vector<64x256xf32>
    %70 = arith.addf %63, %69 : vector<64x256xf32>
    %cst_53 = arith.constant 0.797884583 : f32
    %71 = vector.broadcast %cst_53 : f32 to vector<64x256xf32>
    %72 = arith.mulf %71, %70 : vector<64x256xf32>
    %73 = math.tanh %72 : vector<64x256xf32>
    %cst_54 = arith.constant 1.000000e+00 : f32
    %74 = vector.broadcast %cst_54 : f32 to vector<64x256xf32>
    %75 = arith.addf %74, %73 : vector<64x256xf32>
    %76 = arith.mulf %65, %75 : vector<64x256xf32>
    %c0_55 = arith.constant 0 : index
    %c0_56 = arith.constant 0 : index
    %77 = vector.load %arg10[%c0_55, %c0_56] : memref<64x256xf32, #tpu.memory_space<vmem>>, vector<64x256xf32>
    tpu.vector_store %arg10[%c0_55, %c0_56], %76 {strides = array<i32>} : memref<64x256xf32, #tpu.memory_space<vmem>>, vector<64x256xf32>,
    return
  }
  func.func @transform_0(%arg0: i32) -> (i32, i32) {
    %c0_i32 = arith.constant 0 : i32
    %c0_i32_0 = arith.constant 0 : i32
    %c0_i32_1 = arith.constant 0 : i32
    return %c0_i32, %c0_i32_0 : i32, i32
  }
  func.func @transform_1(%arg0: i32) -> (i32, i32) {
    %c0_i32 = arith.constant 0 : i32
    %c0_i32_0 = arith.constant 0 : i32
    %c0_i32_1 = arith.constant 0 : i32
    return %c0_i32, %c0_i32_0 : i32, i32
  }
  func.func @transform_2(%arg0: i32) -> (i32, i32, i32) {
    %c0_i32 = arith.constant 0 : i32
    %c0_i32_0 = arith.constant 0 : i32
    %c0_i32_1 = arith.constant 0 : i32
    %c0_i32_2 = arith.constant 0 : i32
    return %c0_i32, %c0_i32_0, %c0_i32_1 : i32, i32, i32
  }
  func.func @transform_3(%arg0: i32) -> (i32, i32, i32) {
    %c0_i32 = arith.constant 0 : i32
    %c0_i32_0 = arith.constant 0 : i32
    %c0_i32_1 = arith.constant 0 : i32
    %c0_i32_2 = arith.constant 0 : i32
    return %c0_i32, %c0_i32_0, %c0_i32_1 : i32, i32, i32
  }
  func.func @transform_4(%arg0: i32) -> (i32, i32) {
    %c0_i32 = arith.constant 0 : i32
    %c0_i32_0 = arith.constant 0 : i32
    %c0_i32_1 = arith.constant 0 : i32
    return %c0_i32, %c0_i32_0 : i32, i32
  }
  func.func @transform_5(%arg0: i32) -> (i32, i32) {
    %c0_i32 = arith.constant 0 : i32
    %c0_i32_0 = arith.constant 0 : i32
    %c0_i32_1 = arith.constant 0 : i32
    return %c0_i32, %c0_i32_0 : i32, i32
  }
  func.func @transform_6(%arg0: i32) -> (i32, i32) {
    %c0_i32 = arith.constant 0 : i32
    %c0_i32_0 = arith.constant 0 : i32
    %c0_i32_1 = arith.constant 0 : i32
    return %c0_i32, %c0_i32_0 : i32, i32
  }
  func.func @transform_7(%arg0: i32) -> (i32, i32, i32) {
    %c0_i32 = arith.constant 0 : i32
    %c0_i32_0 = arith.constant 0 : i32
    %c0_i32_1 = arith.constant 0 : i32
    %c0_i32_2 = arith.constant 0 : i32
    return %c0_i32, %c0_i32_0, %c0_i32_1 : i32, i32, i32
  }
  func.func @transform_8(%arg0: i32) -> (i32, i32) {
    %c0_i32 = arith.constant 0 : i32
    %c0_i32_0 = arith.constant 0 : i32
    %c0_i32_1 = arith.constant 0 : i32
    return %c0_i32, %c0_i32_0 : i32, i32
  }
  func.func @transform_9(%arg0: i32) -> (i32, i32) {
    %c0_i32 = arith.constant 0 : i32
    %c0_i32_0 = arith.constant 0 : i32
    %c0_i32_1 = arith.constant 0 : i32
    return %c0_i32, %c0_i32_0 : i32, i32
  }
}

</mosaic_0001>

<bundles_post_ra>
// kernel: tile.13
= control target key start
LH: loop header
LB: loop body
LE: loop exit
PB: predicated region body
PF: predicated region fallthrough
CT: control target
= control target key end

     0   :  { %s40_s0 = inlined_call_operand.vmem [shape: f32[2], index: 0, kind: input, shape index: {}]   ;;  %s41_s1 = inlined_call_operand.vmem [shape: f32[32,2], index: 1, kind: output, shape index: {}]  }
   0x1   :  { %v4_v0 = vld [vmem:[%s40_s0] ss:$0 sm:$0xff] }
   0x2   :  { %5 = vst [vmem:[%s41_s1] sm:$0xff] %v4_v0 }
   0x3   :  { %12 = vst [vmem:[%s41_s1 + $0x8] sm:$0xff] %v4_v0 }
   0x4   :  { %13 = vst [vmem:[%s41_s1 + $0x10] sm:$0xff] %v4_v0 }
   0x5   :  { %14 = vst [vmem:[%s41_s1 + $0x18] sm:$0xff] %v4_v0 }

// kernel: tile.14
= control target key start
LH: loop header
LB: loop body
LE: loop exit
PB: predicated region body
PF: predicated region fallthrough
CT: control target
= control target key end

     0   :  { %s259_s10 = smov 62   ;;  %s260_s11 = smov 58   ;;  %vm3_vm0 = vcmask 15360   ;;  %vm9_vm1 = vcmask 523760   ;;  %vm15_vm2 = vcmask 507360   ;;  %vm21_vm3 = vcmask 490960   ;;  %s399_s0 = inlined_call_operand.vmem [shape: f32[32,2], index: 0, kind: input, shape index: {}]   ;;  %s400_s1 = inlined_call_operand.vmem [shape: f32[64], index: 1, kind: output, shape index: {}]  }
   0x1   :  { %v197_v0 = vld [vmem:[%s399_s0 + $0x1f] sm:$0x1]   ;;  %v199_v1 = vld [vmem:[%s399_s0 + $0x1d] sm:$0x1]   ;;  %v201_v2 = vld [vmem:[%s399_s0 + $0x1b] sm:$0x1]  }
   0x2   :  { %7 = vrot.lane.b32.xlu0 %v197_v0, %s259_s10  ;;  %19 = vrot.lane.b32.xlu1 %v199_v1, %s260_s11  ;;  %s261_s14 = smov 54   ;;  %v198_v3 = vld [vmem:[%s399_s0 + $0x1e] sm:$0x1]   ;;  %v200_v4 = vld [vmem:[%s399_s0 + $0x1c] sm:$0x1]   ;;  %s262_s19 = smov 60  }
   0x3   :  { %31 = vrot.lane.b32.xlu2 %v201_v2, %s261_s14  ;;  %s263_s20 = smov 56   ;;  %v202_v5 = vld [vmem:[%s399_s0 + $0x1a] sm:$0x1]   ;;  %s264_s23 = smov 52   ;;  %v203_v6 = vld [vmem:[%s399_s0 + $0x19] sm:$0x1]  }
   0x4   :  { %v204_v7 = vld [vmem:[%s399_s0 + $0x18] sm:$0x1]   ;;  %s265_s28 = smov 50   ;;  %s266_s29 = smov 48   ;;  %v205_v8 = vld [vmem:[%s399_s0 + $0x17] sm:$0x1]  }
   0x5   :  { %s267_s3 = smov 46   ;;  %v206_v9 = vld [vmem:[%s399_s0 + $0x16] sm:$0x1]   ;;  %v207_v10 = vld [vmem:[%s399_s0 + $0x15] sm:$0x1]   ;;  %s268_s8 = smov 44  }
   0x6   :  { %s269_s9 = smov 42   ;;  %v208_v11 = vld [vmem:[%s399_s0 + $0x14] sm:$0x1]   ;;  %s270_s12 = smov 40   ;;  %v209_v12 = vld [vmem:[%s399_s0 + $0x13] sm:$0x1]  }
   0x7   :  { %v210_v13 = vld [vmem:[%s399_s0 + $0x12] sm:$0x1]   ;;  %s271_s17 = smov 38   ;;  %s272_s18 = smov 36   ;;  %v211_v14 = vld [vmem:[%s399_s0 + $0x11] sm:$0x1]  }
   0x8   :  { %s273_s21 = smov 34   ;;  %v212_v15 = vld [vmem:[%s399_s0 + $0x10] sm:$0x1]   ;;  %v213_v16 = vld [vmem:[%s399_s0 + $0xf] sm:$0x1]   ;;  %s274_s26 = smov 32  }
   0x9   :  { %s275_s27 = smov 30   ;;  %v214_v17 = vld [vmem:[%s399_s0 + $0xe] sm:$0x1]   ;;  %s276_s30 = smov 28   ;;  %v215_v18 = vld [vmem:[%s399_s0 + $0xd] sm:$0x1]  }
   0xa   :  { %13 = vrot.lane.b32.xlu0 %v198_v3, %s262_s19  ;;  %25 = vrot.lane.b32.xlu1 %v200_v4, %s263_s20  ;;  %v216_v19 = vld [vmem:[%s399_s0 + $0xc] sm:$0x1]   ;;  %s277_s6 = smov 26   ;;  %s278_s7 = smov 24   ;;  %v217_v20 = vld [vmem:[%s399_s0 + $0xb] sm:$0x1]  }
   0xb   :  { %37 = vrot.lane.b32.xlu2 %v202_v5, %s264_s23  ;;  %s279_s10 = smov 22   ;;  %v218_v21 = vld [vmem:[%s399_s0 + $0xa] sm:$0x1]   ;;  %v219_v22 = vld [vmem:[%s399_s0 + $0x9] sm:$0x1]   ;;  %s280_s15 = smov 20  }
   0xc   :  { %s281_s16 = smov 18   ;;  %v220_v23 = vld [vmem:[%s399_s0 + $0x8] sm:$0x1]   ;;  %s282_s19 = smov 16   ;;  %v221_v24 = vld [vmem:[%s399_s0 + $0x7] sm:$0x1]  }
   0xd   :  { %v222_v25 = vld [vmem:[%s399_s0 + $0x6] sm:$0x1]   ;;  %s283_s24 = smov 14   ;;  %s284_s25 = smov 12   ;;  %v223_v26 = vld [vmem:[%s399_s0 + $0x5] sm:$0x1]  }
   0xe   :  { %v224_v27 = vld [vmem:[%s399_s0 + $0x4] sm:$0x1]   ;;  %v225_v28 = vld [vmem:[%s399_s0 + $0x3] sm:$0x1]   ;;  %s286_s4 = smov 8   ;;  %s287_s5 = smov 6  }
   0xf   :  { %v226_v29 = vld [vmem:[%s399_s0 + $0x2] sm:$0x1]   ;;  %v227_v30 = vld [vmem:[%s399_s0 + $0x1] sm:$0x1]   ;;  %s289_s11 = smov 2   ;;  %vm27_vm4 = vcmask 474560  }
  0x10   :  { %v2_v31 = vld [vmem:[%s399_s0] sm:$0x1]   ;;  %vm33_vm5 = vcmask 458160   ;;  %vm39_vm6 = vcmask 441760   ;;  %vm45_vm7 = vcmask 425360   ;;  %vm51_vm8 = vcmask 408960  }
  0x11   :  { %4 = vst.msk [vmem:[#allocation0] sm:$0x1] %vm3_vm0, %v2_v31   ;;  %vm57_vm9 = vcmask 392560   ;;  %vm63_vm10 = vcmask 376160   ;;  %vm69_vm11 = vcmask 359760   ;;  %vm75_vm12 = vcmask 343360  }
  0x12   :  { %43 = vrot.lane.b32.xlu0 %v203_v6, %s265_s28  ;;  %49 = vrot.lane.b32.xlu1 %v204_v7, %s266_s29  ;;  %s285_s28 = smov 10   ;;  %vm81_vm13 = vcmask 326960   ;;  %vm87_vm14 = vcmask 310560   ;;  %vm93_vm15 = vcmask 294160   ;;  %vm99_vm0 = vcmask 277760  }
  0x13   :  { %55 = vrot.lane.b32.xlu2 %v205_v8, %s267_s3 }
  0x1a   :  { %61 = vrot.lane.b32.xlu0 %v206_v9, %s268_s8  ;;  %67 = vrot.lane.b32.xlu1 %v207_v10, %s269_s9  ;;  %s288_s8 = smov 4  }
  0x1b   :  { %73 = vrot.lane.b32.xlu2 %v208_v11, %s270_s12 }
  0x22   :  { %79 = vrot.lane.b32.xlu0 %v209_v12, %s271_s17  ;;  %85 = vrot.lane.b32.xlu1 %v210_v13, %s272_s18 }
  0x23   :  { %91 = vrot.lane.b32.xlu2 %v211_v14, %s273_s21 }
  0x2a   :  { %97 = vrot.lane.b32.xlu0 %v212_v15, %s274_s26  ;;  %103 = vrot.lane.b32.xlu1 %v213_v16, %s275_s27 }
  0x2b   :  { %109 = vrot.lane.b32.xlu2 %v214_v17, %s276_s30 }
  0x32   :  { %115 = vrot.lane.b32.xlu0 %v215_v18, %s277_s6  ;;  %121 = vrot.lane.b32.xlu1 %v216_v19, %s278_s7 }
  0x33   :  { %127 = vrot.lane.b32.xlu2 %v217_v20, %s279_s10 }
  0x3a   :  { %133 = vrot.lane.b32.xlu0 %v218_v21, %s280_s15  ;;  %139 = vrot.lane.b32.xlu1 %v219_v22, %s281_s16 }
  0x3b   :  { %145 = vrot.lane.b32.xlu2 %v220_v23, %s282_s19 }
  0x42   :  { %151 = vrot.lane.b32.xlu0 %v221_v24, %s283_s24  ;;  %157 = vrot.lane.b32.xlu1 %v222_v25, %s284_s25 }
  0x43   :  { %163 = vrot.lane.b32.xlu2 %v223_v26, %s285_s28 }
  0x4a   :  { %169 = vrot.lane.b32.xlu0 %v224_v27, %s286_s4  ;;  %175 = vrot.lane.b32.xlu1 %v225_v28, %s287_s5 }
  0x4b   :  { %181 = vrot.lane.b32.xlu2 %v226_v29, %s288_s8 }
  0x52   :  { %187 = vrot.lane.b32.xlu0 %v227_v30, %s289_s11 }
  0x5d   :  { %v32_v32 = vpop.permute.xlu2 %31  }
  0x65   :  { %v38_v33 = vpop.permute.xlu2 %37  }
  0x6d   :  { %v56_v34 = vpop.permute.xlu2 %55  }
  0x74   :  { %v8_v35 = vpop.permute.xlu0 %7   ;;  %v20_v36 = vpop.permute.xlu1 %19  }
  0x75   :  { %10 = vst.msk [vmem:[#allocation0] sm:$0x1] %vm9_vm1, %v8_v35   ;;  %v74_v37 = vpop.permute.xlu2 %73   ;;  %vm105_vm1 = vcmask 261360  }
  0x7c   :  { %v14_v38 = vpop.permute.xlu0 %13   ;;  %v26_v39 = vpop.permute.xlu1 %25  }
  0x7d   :  { %16 = vst.msk [vmem:[#allocation0] sm:$0x1] %vm15_vm2, %v14_v38   ;;  %v92_v40 = vpop.permute.xlu2 %91   ;;  %vm111_vm2 = vcmask 244960  }
  0x7e   :  { %22 = vst.msk [vmem:[#allocation0] sm:$0x1] %vm21_vm3, %v20_v36   ;;  %vm117_vm3 = vcmask 228560  }
  0x7f   :  { %28 = vst.msk [vmem:[#allocation0] sm:$0x1] %vm27_vm4, %v26_v39   ;;  %vm123_vm4 = vcmask 212160  }
  0x80   :  { %34 = vst.msk [vmem:[#allocation0] sm:$0x1] %vm33_vm5, %v32_v32   ;;  %vm129_vm5 = vcmask 195760  }
  0x81   :  { %40 = vst.msk [vmem:[#allocation0] sm:$0x1] %vm39_vm6, %v38_v33   ;;  %vm135_vm6 = vcmask 179360  }
  0x84   :  { %v44_v41 = vpop.permute.xlu0 %43   ;;  %v50_v42 = vpop.permute.xlu1 %49  }
  0x85   :  { %46 = vst.msk [vmem:[#allocation0] sm:$0x1] %vm45_vm7, %v44_v41   ;;  %v110_v43 = vpop.permute.xlu2 %109   ;;  %vm141_vm7 = vcmask 162960  }
  0x86   :  { %52 = vst.msk [vmem:[#allocation0] sm:$0x1] %vm51_vm8, %v50_v42   ;;  %vm147_vm8 = vcmask 146560  }
  0x87   :  { %58 = vst.msk [vmem:[#allocation0] sm:$0x1] %vm57_vm9, %v56_v34   ;;  %vm153_vm9 = vcmask 130160  }
  0x8c   :  { %v62_v44 = vpop.permute.xlu0 %61   ;;  %v68_v45 = vpop.permute.xlu1 %67  }
  0x8d   :  { %64 = vst.msk [vmem:[#allocation0] sm:$0x1] %vm63_vm10, %v62_v44   ;;  %v128_v46 = vpop.permute.xlu2 %127   ;;  %vm159_vm10 = vcmask 113760  }
  0x8e   :  { %70 = vst.msk [vmem:[#allocation0] sm:$0x1] %vm69_vm11, %v68_v45   ;;  %vm165_vm11 = vcmask 97360  }
  0x8f   :  { %76 = vst.msk [vmem:[#allocation0] sm:$0x1] %vm75_vm12, %v74_v37   ;;  %vm171_vm12 = vcmask 80960  }
  0x94   :  { %v80_v47 = vpop.permute.xlu0 %79   ;;  %v86_v48 = vpop.permute.xlu1 %85  }
  0x95   :  { %82 = vst.msk [vmem:[#allocation0] sm:$0x1] %vm81_vm13, %v80_v47   ;;  %v146_v49 = vpop.permute.xlu2 %145   ;;  %vm177_vm13 = vcmask 64560  }
  0x96   :  { %88 = vst.msk [vmem:[#allocation0] sm:$0x1] %vm87_vm14, %v86_v48   ;;  %vm183_vm14 = vcmask 48160  }
  0x97   :  { %94 = vst.msk [vmem:[#allocation0] sm:$0x1] %vm93_vm15, %v92_v40   ;;  %vm189_vm15 = vcmask 31760  }
  0x9c   :  { %v98_v50 = vpop.permute.xlu0 %97   ;;  %v104_v51 = vpop.permute.xlu1 %103  }
  0x9d   :  { %100 = vst.msk [vmem:[#allocation0] sm:$0x1] %vm99_vm0, %v98_v50   ;;  %v164_v52 = vpop.permute.xlu2 %163  }
  0x9e   :  { %106 = vst.msk [vmem:[#allocation0] sm:$0x1] %vm105_vm1, %v104_v51  }
  0x9f   :  { %112 = vst.msk [vmem:[#allocation0] sm:$0x1] %vm111_vm2, %v110_v43  }
  0xa4   :  { %v116_v53 = vpop.permute.xlu0 %115   ;;  %v122_v54 = vpop.permute.xlu1 %121  }
  0xa5   :  { %118 = vst.msk [vmem:[#allocation0] sm:$0x1] %vm117_vm3, %v116_v53   ;;  %v182_v55 = vpop.permute.xlu2 %181  }
  0xa6   :  { %124 = vst.msk [vmem:[#allocation0] sm:$0x1] %vm123_vm4, %v122_v54  }
  0xa7   :  { %130 = vst.msk [vmem:[#allocation0] sm:$0x1] %vm129_vm5, %v128_v46  }
  0xac   :  { %v134_v56 = vpop.permute.xlu0 %133   ;;  %v140_v57 = vpop.permute.xlu1 %139  }
  0xad   :  { %136 = vst.msk [vmem:[#allocation0] sm:$0x1] %vm135_vm6, %v134_v56  }
  0xae   :  { %142 = vst.msk [vmem:[#allocation0] sm:$0x1] %vm141_vm7, %v140_v57  }
  0xaf   :  { %148 = vst.msk [vmem:[#allocation0] sm:$0x1] %vm147_vm8, %v146_v49  }
  0xb4   :  { %v152_v58 = vpop.permute.xlu0 %151   ;;  %v158_v59 = vpop.permute.xlu1 %157  }
  0xb5   :  { %154 = vst.msk [vmem:[#allocation0] sm:$0x1] %vm153_vm9, %v152_v58  }
  0xb6   :  { %160 = vst.msk [vmem:[#allocation0] sm:$0x1] %vm159_vm10, %v158_v59  }
  0xb7   :  { %166 = vst.msk [vmem:[#allocation0] sm:$0x1] %vm165_vm11, %v164_v52  }
  0xbc   :  { %v170_v60 = vpop.permute.xlu0 %169   ;;  %v176_v61 = vpop.permute.xlu1 %175  }
  0xbd   :  { %172 = vst.msk [vmem:[#allocation0] sm:$0x1] %vm171_vm12, %v170_v60  }
  0xbe   :  { %178 = vst.msk [vmem:[#allocation0] sm:$0x1] %vm177_vm13, %v176_v61  }
  0xbf   :  { %184 = vst.msk [vmem:[#allocation0] sm:$0x1] %vm183_vm14, %v182_v55  }
  0xc4   :  { %v188_v62 = vpop.permute.xlu0 %187  }
  0xc5   :  { %190 = vst.msk [vmem:[#allocation0] sm:$0x1] %vm189_vm15, %v188_v62  }
  0xcc   :  { %v193_v63 = vld [vmem:[#allocation0] sm:$0x1] }
  0xcd   :  { %196 = vst [vmem:[%s400_s1] sm:$0x1] %v193_v63 }

// kernel: tile.18
= control target key start
LH: loop header
LB: loop body
LE: loop exit
PB: predicated region body
PF: predicated region fallthrough
CT: control target
= control target key end

     0   :  { %s40_s0 = inlined_call_operand.vmem [shape: f32[8], index: 0, kind: input, shape index: {}]   ;;  %s41_s1 = inlined_call_operand.vmem [shape: f32[32,8], index: 1, kind: output, shape index: {}]  }
   0x1   :  { %v4_v0 = vld [vmem:[%s40_s0] ss:$0 sm:$0xff] }
   0x2   :  { %5 = vst [vmem:[%s41_s1] sm:$0xff] %v4_v0 }
   0x3   :  { %12 = vst [vmem:[%s41_s1 + $0x8] sm:$0xff] %v4_v0 }
   0x4   :  { %13 = vst [vmem:[%s41_s1 + $0x10] sm:$0xff] %v4_v0 }
   0x5   :  { %14 = vst [vmem:[%s41_s1 + $0x18] sm:$0xff] %v4_v0 }

// kernel: tile.19
= control target key start
LH: loop header
LB: loop body
LE: loop exit
PB: predicated region body
PF: predicated region fallthrough
CT: control target
= control target key end

     0   :  { %s7_s6 = smov 3  ;;  %s21_s9 = smov 3  ;;  %vm4_vm0 = vcmask 64512   ;;  %vm11_vm1 = vcmask 1048512   ;;  %vm18_vm2 = vcmask 982912   ;;  %vm25_vm3 = vcmask 917312   ;;  %s233_s0 = inlined_call_operand.vmem [shape: f32[32,8], index: 0, kind: input, shape index: {}]   ;;  %s234_s1 = inlined_call_operand.vmem [shape: f32[1,256], index: 1, kind: output, shape index: {}]  }
   0x1   :  { %v123_v0 = vld [vmem:[%s233_s0 + $0xf] ss:$16 sm:%s7_s6]   ;;  %s154_s10 = smov 120   ;;  %v125_v1 = vld [vmem:[%s233_s0 + $0xd] ss:$16 sm:%s21_s9]   ;;  %s155_s13 = smov 104  }
   0x2   :  { %9 = vrot.lane.b32.xlu0 %v123_v0, %s154_s10  ;;  %23 = vrot.lane.b32.xlu1 %v125_v1, %s155_s13  ;;  %s14_s14 = smov 3  ;;  %s28_s15 = smov 3  ;;  %vm32_vm4 = vcmask 851712   ;;  %vm39_vm5 = vcmask 786112   ;;  %vm46_vm6 = vcmask 720512   ;;  %vm53_vm7 = vcmask 654912  }
   0x3   :  { %v124_v2 = vld [vmem:[%s233_s0 + $0xe] ss:$16 sm:%s14_s14]   ;;  %v126_v3 = vld [vmem:[%s233_s0 + $0xc] ss:$16 sm:%s28_s15]   ;;  %s35_s20 = smov 3  ;;  %s156_s23 = smov 112  }
   0x4   :  { %v127_v4 = vld [vmem:[%s233_s0 + $0xb] ss:$16 sm:%s35_s20]   ;;  %s157_s24 = smov 88   ;;  %s158_s25 = smov 96   ;;  %vm60_vm8 = vcmask 589312   ;;  %vm67_vm9 = vcmask 523712  }
   0x5   :  { %37 = vrot.lane.b32.xlu2 %v127_v4, %s157_s24  ;;  %s49_s26 = smov 3  ;;  %s42_s27 = smov 3  ;;  %vm74_vm10 = vcmask 458112   ;;  %vm81_vm11 = vcmask 392512   ;;  %vm88_vm12 = vcmask 326912   ;;  %vm95_vm13 = vcmask 261312  }
   0x6   :  { %s56_s28 = smov 3  ;;  %v129_v5 = vld [vmem:[%s233_s0 + $0x9] ss:$16 sm:%s49_s26]   ;;  %v128_v6 = vld [vmem:[%s233_s0 + $0xa] ss:$16 sm:%s42_s27]   ;;  %s159_s6 = smov 72  }
   0x7   :  { %v130_v7 = vld [vmem:[%s233_s0 + $0x8] ss:$16 sm:%s56_s28]   ;;  %s160_s7 = smov 80   ;;  %s161_s8 = smov 64   ;;  %vm102_vm14 = vcmask 195712   ;;  %vm109_vm15 = vcmask 130112  }
   0x8   :  { %s70_s9 = smov 3  ;;  %s63_s10 = smov 3 }
   0x9   :  { %s77_s11 = smov 3  ;;  %v132_v8 = vld [vmem:[%s233_s0 + $0x6] ss:$16 sm:%s70_s9]   ;;  %v131_v9 = vld [vmem:[%s233_s0 + $0x7] ss:$16 sm:%s63_s10]   ;;  %s162_s18 = smov 48  }
   0xa   :  { %16 = vrot.lane.b32.xlu0 %v124_v2, %s156_s23  ;;  %30 = vrot.lane.b32.xlu1 %v126_v3, %s158_s25  ;;  %v133_v10 = vld [vmem:[%s233_s0 + $0x5] ss:$16 sm:%s77_s11]   ;;  %s163_s19 = smov 56   ;;  %s164_s20 = smov 40  }
   0xb   :  { %s91_s21 = smov 3  ;;  %s84_s22 = smov 3 }
   0xc   :  { %s98_s23 = smov 3  ;;  %v135_v11 = vld [vmem:[%s233_s0 + $0x3] ss:$16 sm:%s91_s21]   ;;  %v134_v12 = vld [vmem:[%s233_s0 + $0x4] ss:$16 sm:%s84_s22]   ;;  %s165_s30 = smov 24  }
   0xd   :  { %44 = vrot.lane.b32.xlu2 %v128_v6, %s160_s7  ;;  %v136_v13 = vld [vmem:[%s233_s0 + $0x2] ss:$16 sm:%s98_s23]   ;;  %s166_s2 = smov 32   ;;  %s167_s3 = smov 16  }
   0xe   :  { %s105_s4 = smov 3  ;;  %s168_s7 = smov 8  }
   0xf   :  { %v137_v14 = vld [vmem:[%s233_s0 + $0x1] ss:$16 sm:%s105_s4]  }
  0x12   :  { %51 = vrot.lane.b32.xlu0 %v129_v5, %s159_s6  ;;  %58 = vrot.lane.b32.xlu1 %v130_v7, %s161_s8  ;;  %s2_s8 = smov 3 }
  0x13   :  { %v3_v15 = vld [vmem:[%s233_s0] ss:$16 sm:%s2_s8]  }
  0x14   :  { %5 = vst.msk [vmem:[#allocation0] ss:$8 sm:$0x3] %vm4_vm0, %v3_v15  }
  0x15   :  { %65 = vrot.lane.b32.xlu2 %v131_v9, %s163_s19 }
  0x1a   :  { %72 = vrot.lane.b32.xlu0 %v132_v8, %s162_s18  ;;  %79 = vrot.lane.b32.xlu1 %v133_v10, %s164_s20 }
  0x1d   :  { %86 = vrot.lane.b32.xlu2 %v134_v12, %s166_s2 }
  0x22   :  { %93 = vrot.lane.b32.xlu0 %v135_v11, %s165_s30  ;;  %100 = vrot.lane.b32.xlu1 %v136_v13, %s167_s3 }
  0x25   :  { %107 = vrot.lane.b32.xlu2 %v137_v14, %s168_s7 }
  0x5f   :  { %v38_v16 = vpop.permute.xlu2 %37  }
  0x67   :  { %v45_v17 = vpop.permute.xlu2 %44  }
  0x6f   :  { %v66_v19 = vpop.permute.xlu2 %65  }
  0x74   :  { %v10_v18 = vpop.permute.xlu0 %9   ;;  %v24_v20 = vpop.permute.xlu1 %23  }
  0x75   :  { %12 = vst.msk [vmem:[#allocation0] ss:$8 sm:$0x3] %vm11_vm1, %v10_v18  }
  0x77   :  { %v87_v22 = vpop.permute.xlu2 %86  }
  0x7c   :  { %v17_v21 = vpop.permute.xlu0 %16   ;;  %v31_v23 = vpop.permute.xlu1 %30  }
  0x7d   :  { %19 = vst.msk [vmem:[#allocation0] ss:$8 sm:$0x3] %vm18_vm2, %v17_v21  }
  0x7e   :  { %26 = vst.msk [vmem:[#allocation0] ss:$8 sm:$0x3] %vm25_vm3, %v24_v20  }
  0x7f   :  { %33 = vst.msk [vmem:[#allocation0] ss:$8 sm:$0x3] %vm32_vm4, %v31_v23   ;;  %v108_v25 = vpop.permute.xlu2 %107  }
  0x80   :  { %40 = vst.msk [vmem:[#allocation0] ss:$8 sm:$0x3] %vm39_vm5, %v38_v16  }
  0x81   :  { %47 = vst.msk [vmem:[#allocation0] ss:$8 sm:$0x3] %vm46_vm6, %v45_v17  }
  0x84   :  { %v52_v24 = vpop.permute.xlu0 %51   ;;  %v59_v26 = vpop.permute.xlu1 %58  }
  0x85   :  { %54 = vst.msk [vmem:[#allocation0] ss:$8 sm:$0x3] %vm53_vm7, %v52_v24  }
  0x86   :  { %61 = vst.msk [vmem:[#allocation0] ss:$8 sm:$0x3] %vm60_vm8, %v59_v26  }
  0x87   :  { %68 = vst.msk [vmem:[#allocation0] ss:$8 sm:$0x3] %vm67_vm9, %v66_v19  }
  0x8c   :  { %v73_v27 = vpop.permute.xlu0 %72   ;;  %v80_v28 = vpop.permute.xlu1 %79  }
  0x8d   :  { %75 = vst.msk [vmem:[#allocation0] ss:$8 sm:$0x3] %vm74_vm10, %v73_v27  }
  0x8e   :  { %82 = vst.msk [vmem:[#allocation0] ss:$8 sm:$0x3] %vm81_vm11, %v80_v28  }
  0x8f   :  { %89 = vst.msk [vmem:[#allocation0] ss:$8 sm:$0x3] %vm88_vm12, %v87_v22  }
  0x94   :  { %v94_v29 = vpop.permute.xlu0 %93   ;;  %v101_v30 = vpop.permute.xlu1 %100  }
  0x95   :  { %96 = vst.msk [vmem:[#allocation0] ss:$8 sm:$0x3] %vm95_vm13, %v94_v29  }
  0x96   :  { %103 = vst.msk [vmem:[#allocation0] ss:$8 sm:$0x3] %vm102_vm14, %v101_v30  }
  0x97   :  { %110 = vst.msk [vmem:[#allocation0] ss:$8 sm:$0x3] %vm109_vm15, %v108_v25  }
  0x9e   :  { %v113_v31 = vld [vmem:[#allocation0] sm:$0x1]  ;;  %v118_v32 = vld [vmem:[#allocation0 + $0x8] sm:$0x1] }
  0x9f   :  { %116 = vst [vmem:[%s234_s1] sm:$0x1] %v113_v31 }
  0xa0   :  { %138 = vst [vmem:[%s234_s1 + $0x1] sm:$0x1] %v118_v32 }

// kernel: up_forward_pallas.1
= control target key start
LH: loop header
LB: loop body
LE: loop exit
PB: predicated region body
PF: predicated region fallthrough
CT: control target
= control target key end

     0   :  { %vm95_vm0 = vcmask 523264   ;;  %vm219_vm1 = vcmask 1043456   ;;  %vm212_vm2 = vcmask 64512   ;;  %vm412_vm3 = vcmask 261120   ;;  %s2748_s1 = inlined_call_operand.vmem [shape: bf16[64,136], index: 1, kind: input, shape index: {}]   ;;  %s2749_s3 = inlined_call_operand.vmem [shape: bf16[3,136,68], index: 3, kind: input, shape index: {}]   ;;  %s2750_s0 = inlined_call_operand.vmem [shape: bf16[32,64], index: 0, kind: input, shape index: {}]   ;;  %s2751_s2 = inlined_call_operand.vmem [shape: bf16[3,64,32], index: 2, kind: input, shape index: {}]   ;;  %s2752_s4 = inlined_call_operand.vmem [shape: f32[1,68], index: 4, kind: input, shape index: {}]   ;;  %s2753_s7 = inlined_call_operand.vmem [shape: bf16[3,68,256], index: 7, kind: input, shape index: {}]   ;;  %s2754_s5 = inlined_call_operand.vmem [shape: bf16[64,64], index: 5, kind: input, shape index: {}]   ;;  %s2755_s6 = inlined_call_operand.vmem [shape: bf16[64,64], index: 6, kind: input, shape index: {}]   ;;  %s2756_s8 = inlined_call_operand.vmem [shape: f32[1,256], index: 8, kind: input, shape index: {}]   ;;  %s2757_s9 = inlined_call_operand.vmem [shape: f32[64,256], index: 9, kind: output, shape index: {}]  }
   0x1   :  { %v1569_v0 = vld [vmem:[%s2748_s1 + $0x30] sm:$0xf]  ;;  %v1978_v1 = vld [vmem:[%s2748_s1 + $0x34] sm:$0xf0]  ;;  %v1977_v2 = vld [vmem:[%s2748_s1 + $0x34] sm:$0xf] }
   0x2   :  { %v1570_v3 = vor.u32 %v1978_v1, %v1569_v0  ;;  %v1571_v4 = vld [vmem:[%s2748_s1 + $0x38] sm:$0xf0]  ;;  %v1561_v5 = vld [vmem:[%s2748_s1 + $0x20] sm:$0xf]  ;;  %v1976_v6 = vld [vmem:[%s2748_s1 + $0x24] sm:$0xf0] }
   0x3   :  { %v1574_v7 = vor.u32 %v1977_v2, %v1571_v4  ;;  %v1975_v8 = vld [vmem:[%s2748_s1 + $0x24] sm:$0xf]  ;;  %v1563_v9 = vld [vmem:[%s2748_s1 + $0x28] sm:$0xf0]  ;;  %v1562_v10 = vor.u32 %v1976_v6, %v1561_v5  ;;  %v1553_v12 = vld [vmem:[%s2748_s1 + $0x10] sm:$0xf] }
   0x4   :  { %106 = vmatpush.bf16.msra.mxu0 %v1570_v3  ;;  %v1566_v11 = vor.u32 %v1975_v8, %v1563_v9  ;;  %v1974_v13 = vld [vmem:[%s2748_s1 + $0x14] sm:$0xf0]  ;;  %v1973_v14 = vld [vmem:[%s2748_s1 + $0x14] sm:$0xf]  ;;  %v1555_v15 = vld [vmem:[%s2748_s1 + $0x18] sm:$0xf0] }
   0x5   :  { %125 = vmatpush.bf16.msra.mxu1 %v1574_v7  ;;  %v1986_v16 = vld [vmem:[%s2749_s3 + $0x38] sm:$0xff]  ;;  %v1554_v17 = vor.u32 %v1974_v13, %v1553_v12  ;;  %v1558_v18 = vor.u32 %v1973_v14, %v1555_v15  ;;  %v1545_v19 = vld [vmem:[%s2748_s1] sm:$0xf]  ;;  %v1972_v20 = vld [vmem:[%s2748_s1 + $0x4] sm:$0xf0]  ;;  %vm1016_vm4 = vcmask 1041408  }
   0x6   :  { %223 = vmatpush.bf16.msra.mxu2 %v1986_v16  ;;  %v1985_v21 = vld [vmem:[%s2749_s3 + $0x30] sm:$0xff]  ;;  %v1971_v22 = vld [vmem:[%s2748_s1 + $0x4] sm:$0xf]  ;;  %v1547_v23 = vld [vmem:[%s2748_s1 + $0x8] sm:$0xf0]  ;;  %v1546_v24 = vor.u32 %v1972_v20, %v1545_v19  ;;  %vm1003_vm5 = vcmask 556032  }
   0x7   :  { %v1550_v25 = vor.u32 %v1971_v22, %v1547_v23  ;;  %v1998_v26 = vld [vmem:[%s2749_s3 + $0x7c] sm:$0xff]  ;;  %v1984_v27 = vld [vmem:[%s2749_s3 + $0x28] sm:$0xff]  ;;  %v1997_v29 = vld [vmem:[%s2749_s3 + $0x74] sm:$0xff] }
   0x8   :  { %107 = vmatpush.bf16.msra.mxu0 %v1562_v10  ;;  %v1969_v28 = vld [vmem:[%s2750_s0] sm:$0xff]  ;;  %v1996_v31 = vld [vmem:[%s2749_s3 + $0x6c] sm:$0xff]  ;;  %v1982_v32 = vld [vmem:[%s2749_s3 + $0x18] sm:$0xff] }
   0x9   :  { %126 = vmatpush.bf16.msra.mxu1 %v1566_v11  ;;  %v1983_v30 = vld [vmem:[%s2749_s3 + $0x20] sm:$0xff]  ;;  %v1970_v35 = vld [vmem:[%s2750_s0 + $0x8] sm:$0xff]  ;;  %v1981_v36 = vld [vmem:[%s2749_s3 + $0x10] sm:$0xff] }
   0xa   :  { %224 = vmatpush.bf16.msra.mxu2 %v1985_v21  ;;  %v1995_v33 = vld [vmem:[%s2749_s3 + $0x64] sm:$0xff]  ;;  %v1994_v34 = vld [vmem:[%s2749_s3 + $0x5c] sm:$0xff]  ;;  %v1993_v37 = vld [vmem:[%s2749_s3 + $0x54] sm:$0xff] }
   0xb   :  { %v1980_v38 = vld [vmem:[%s2749_s3 + $0x8] sm:$0xff]  ;;  %v160_v40 = vld [vmem:[%s2749_s3 + $0x40] sm:$0xf]  ;;  %v2009_v47 = vld [vmem:[%s2749_s3 + $0xb8] sm:$0xff] }
   0xc   :  { %108 = vmatpush.bf16.msra.mxu0 %v1554_v17  ;;  %v1992_v39 = vld [vmem:[%s2749_s3 + $0x4c] sm:$0xff]  ;;  %v194_v41 = vunpack.c.l.b16 %v160_v40  ;;  %v1979_v43 = vld [vmem:[%s2749_s3] sm:$0xff]  ;;  %v2005_v55 = vld [vmem:[%s2749_s3 + $0x98] sm:$0xff] }
   0xd   :  { %127 = vmatpush.bf16.msra.mxu1 %v1558_v18  ;;  %v1991_v44 = vld [vmem:[%s2749_s3 + $0x44] sm:$0xff]  ;;  %v2008_v48 = vld [vmem:[%s2749_s3 + $0xb0] sm:$0xff] }
   0xe   :  { %225 = vmatpush.bf16.msra.mxu2 %v1984_v27  ;;  %v203_v42 = vpack.c.b16 %v194_v41, %v194_v41  ;;  %v2010_v46 = vld [vmem:[%s2749_s3 + $0xc0] sm:$0xff]  ;;  %v2007_v52 = vld [vmem:[%s2749_s3 + $0xa8] sm:$0xff]  ;;  %v2004_v58 = vld [vmem:[%s2749_s3 + $0x90] sm:$0xff] }
   0xf   :  { %v1629_v49 = vld [vmem:[%s2749_s3 + $0x84] sm:$0xf]  ;;  %v2003_v59 = vld [vmem:[%s2749_s3 + $0x88] sm:$0xff] }
  0x10   :  { %109 = vmatpush.bf16.msra.mxu0 %v1546_v24  ;;  %v221_v45 = vsel %vm219_vm1, %v203_v42, 0  ;;  %v322_v50 = vunpack.c.l.b16 %v1629_v49  ;;  %v2006_v54 = vld [vmem:[%s2749_s3 + $0xa0] sm:$0xff]  ;;  %v1728_v0 = vld [vmem:[%s2749_s3 + $0xc8] sm:$0xf] }
  0x11   :  { %128 = vmatpush.bf16.msra.mxu1 %v1550_v25  ;;  %249 = vmatpush.bf16.msra.mxu3 %v221_v45  ;;  %v566_v1 = vunpack.c.l.b16 %v1728_v0  ;;  %v1999_v41 = vld [vmem:[%s2751_s2 + $0x20] sm:$0xff]  ;;  %v1839_v0 = vld [vmem:[%s2753_s7 + $0x88] sm:$0x33] }
  0x12   :  { %226 = vmatpush.bf16.msra.mxu2 %v1983_v30  ;;  %v331_v51 = vpack.c.b16 %v322_v50, %v322_v50 }
  0x13   :  { %1575 = vmatmul.msk.bf16.vlgmr.msra.gmra.mxu0 %vm95_vm0, %v1969_v28  ;;  %v575_v2 = vpack.c.b16 %v566_v1, %v566_v1 }
  0x14   :  { %343 = vmatpush.bf16.msrb.mxu0 %v1998_v26  ;;  %1577 = vmatmul.msk.bf16.vlgmr.msra.gmra.mxu1 %vm95_vm0, %v1969_v28  ;;  %v341_v53 = vsel %vm219_vm1, %v331_v51, 0 }
  0x15   :  { %2047 = vmatpush.bf16.msrb.mxu1 %v1998_v26  ;;  %587 = vmatpush.bf16.msrb.mxu3 %v2010_v46  ;;  %v585_v5 = vsel %vm219_vm1, %v575_v2, 0  ;;  %v983_v2 = vunpack.c.l.b16 %v1839_v0 }
  0x16   :  { %227 = vmatpush.bf16.msra.mxu2 %v1982_v32 }
  0x18   :  { %344 = vmatpush.bf16.msrb.mxu0 %v1997_v29 }
  0x19   :  { %2048 = vmatpush.bf16.msrb.mxu1 %v1997_v29  ;;  %588 = vmatpush.bf16.msrb.mxu3 %v2009_v47  ;;  %v2000_v47 = vld [vmem:[%s2751_s2 + $0x28] sm:$0xff] }
  0x1a   :  { %228 = vmatpush.bf16.msra.mxu2 %v1981_v36 }
  0x1c   :  { %345 = vmatpush.bf16.msrb.mxu0 %v1996_v31 }
  0x1d   :  { %2049 = vmatpush.bf16.msrb.mxu1 %v1996_v31  ;;  %589 = vmatpush.bf16.msrb.mxu3 %v2008_v48  ;;  %v1989_v48 = vld [vmem:[%s2751_s2 + $0x10] sm:$0xff] }
  0x1e   :  { %229 = vmatpush.bf16.msra.mxu2 %v1980_v38 }
  0x20   :  { %346 = vmatpush.bf16.msrb.mxu0 %v1995_v33 }
  0x21   :  { %2050 = vmatpush.bf16.msrb.mxu1 %v1995_v33  ;;  %590 = vmatpush.bf16.msrb.mxu3 %v2007_v52 }
  0x22   :  { %230 = vmatpush.bf16.msra.mxu2 %v1979_v43  ;;  %v1988_v43 = vld [vmem:[%s2751_s2 + $0x8] sm:$0xff] }
  0x23   :  { %1576 = vmatmul.msk.bf16.gmra.mxu0 %vm95_vm0, %v1970_v35 }
  0x24   :  { %347 = vmatpush.bf16.msrb.mxu0 %v1994_v34  ;;  %1578 = vmatmul.msk.bf16.gmra.mxu1 %vm95_vm0, %v1970_v35 }
  0x25   :  { %2051 = vmatpush.bf16.msrb.mxu1 %v1994_v34  ;;  %591 = vmatpush.bf16.msrb.mxu3 %v2006_v54  ;;  %v1987_v34 = vld [vmem:[%s2751_s2] sm:$0xff] }
  0x28   :  { %348 = vmatpush.bf16.msrb.mxu0 %v1993_v37 }
  0x29   :  { %2052 = vmatpush.bf16.msrb.mxu1 %v1993_v37  ;;  %592 = vmatpush.bf16.msrb.mxu3 %v2005_v55 }
  0x2c   :  { %349 = vmatpush.bf16.msrb.mxu0 %v1992_v39 }
  0x2d   :  { %2053 = vmatpush.bf16.msrb.mxu1 %v1992_v39  ;;  %593 = vmatpush.bf16.msrb.mxu3 %v2004_v58  ;;  %v2001_v58 = vld [vmem:[%s2751_s2 + $0x30] sm:$0xff] }
  0x30   :  { %350 = vmatpush.bf16.msrb.mxu0 %v1991_v44 }
  0x31   :  { %2054 = vmatpush.bf16.msrb.mxu1 %v1991_v44  ;;  %594 = vmatpush.bf16.msrb.mxu3 %v2003_v59  ;;  %v1990_v59 = vld [vmem:[%s2751_s2 + $0x18] sm:$0xff] }
  0x34   :  { %369 = vmatpush.bf16.msra.mxu0 %v341_v53 }
  0x90   :  { %v111_v56 = vpop.f32.mrf.mxu0 }
  0x91   :  { %v130_v57 = vpop.f32.mrf.mxu1 }
  0x98   :  { %v113_v60 = vpop.f32.mrf.mxu0 }
  0x99   :  { %v140_v61 = vpack.c.bf16 %v113_v60, %v111_v56  ;;  %v132_v62 = vpop.f32.mrf.mxu1  ;;  %v2012_v60 = vld [vmem:[%s2751_s2 + $0x48] sm:$0xff] }
  0x9a   :  { %v141_v63 = vpack.c.bf16 %v132_v62, %v130_v57  ;;  %v2011_v57 = vld [vmem:[%s2751_s2 + $0x40] sm:$0xff]  ;;  %v2013_v62 = vld [vmem:[%s2751_s2 + $0x50] sm:$0xff] }
  0x9b   :  { %231 = vmatmul.bf16.vlgmr.msra.gmra.mxu2 %v140_v61  ;;  %351 = vmatmul.bf16.vlgmr.msrb.gmra.mxu0 %v140_v61 }
  0x9c   :  { %1611 = vmatmul.msk.bf16.vlgmr.msra.gmra.mxu3 %vm212_vm2, %v141_v63  ;;  %613 = vmatpush.bf16.msrb.mxu0 %v585_v5  ;;  %v993_v5 = vpack.c.b16 %v983_v2, %v983_v2 }
  0xa0   :  { %v116_v3 = vpop.f32.mrf.mxu0 }
  0xa1   :  { %v135_v4 = vpop.f32.mrf.mxu1 }
  0xa8   :  { %v118_v6 = vpop.f32.mrf.mxu0 }
  0xa9   :  { %v142_v7 = vpack.c.bf16 %v118_v6, %v116_v3  ;;  %v137_v8 = vpop.f32.mrf.mxu1  ;;  %v984_v3 = vunpack.c.h.b16 %v1839_v0 }
  0xaa   :  { %v143_v9 = vpack.c.bf16 %v137_v8, %v135_v4 }
  0xab   :  { %236 = vmatmul.bf16.gmra.mxu2 %v142_v7  ;;  %1662 = vmatmul.msk.bf16.vlgmr.msra.gmra.mxu0 %vm212_vm2, %v141_v63  ;;  %v994_v6 = vpack.c.b16 %v984_v3, %v984_v3 }
  0xac   :  { %1612 = vmatmul.msk.bf16.gmra.mxu3 %vm212_vm2, %v143_v9  ;;  %356 = vmatmul.bf16.vlgmr.msrb.gmra.mxu1 %v142_v7 }
  0xad   :  { %v1021_v8 = vsel %vm1016_vm4, %v994_v6, 0 }
  0xbb   :  { %1663 = vmatmul.msk.bf16.gmra.mxu0 %vm212_vm2, %v143_v9 }
  0xbc   :  { %595 = vmatmul.bf16.vlgmr.msrb.gmra.mxu3 %v140_v61  ;;  %v2002_v61 = vld [vmem:[%s2751_s2 + $0x38] sm:$0xff] }
  0xcb   :  { %1761 = vmatmul.msk.bf16.vlgmr.msrb.gmra.mxu0 %vm212_vm2, %v141_v63  ;;  %v2014_v63 = vld [vmem:[%s2751_s2 + $0x58] sm:$0xff] }
  0xcc   :  { %600 = vmatmul.bf16.gmra.mxu3 %v142_v7  ;;  %v1018_v7 = vsel %vm1016_vm4, %v993_v5, 0 }
  0xdb   :  { %1762 = vmatmul.msk.bf16.gmra.mxu0 %vm212_vm2, %v143_v9  ;;  %v1866_v9 = vld [vmem:[%s2753_s7 + $0x78] sm:$0xf] }
 0x118   :  { %v352_v10 = vpop.f32.mrf.mxu0 }
 0x11e   :  { %v232_v11 = vpop.f32.mrf.mxu2 }
 0x11f   :  { %v251_v12 = vpop.f32.mrf.mxu3 }
 0x120   :  { %v354_v13 = vpop.f32.mrf.mxu0  ;;  %v252_v28 = vadd.f32 %v251_v12, %v232_v11  ;;  %v2037_v11 = vld [vmem:[%s2753_s7 + $0x7c] sm:$0xf] }
 0x126   :  { %v234_v14 = vpop.f32.mrf.mxu2 }
 0x127   :  { %v253_v15 = vpop.f32.mrf.mxu3 }
 0x128   :  { %v371_v16 = vpop.f32.mrf.mxu0  ;;  %v254_v26 = vadd.f32 %v253_v15, %v234_v14 }
 0x129   :  { %v357_v20 = vpop.f32.mrf.mxu1  ;;  %v372_v38 = vadd.f32 %v371_v16, %v352_v10  ;;  %v2038_v10 = vld [vmem:[%s2753_s7 + $0x7c] sm:$0xf0]  ;;  %v1858_v16 = vld [vmem:[%s2753_s7 + $0x68] sm:$0xf] }
 0x12a   :  { %v269_v29 = vpack.c.bf16 %v254_v26, %v252_v28  ;;  %v1867_v12 = vor.u32 %v2038_v10, %v1866_v9 }
 0x12e   :  { %v237_v17 = vpop.f32.mrf.mxu2 }
 0x12f   :  { %v256_v18 = vpop.f32.mrf.mxu3 }
 0x130   :  { %v373_v19 = vpop.f32.mrf.mxu0  ;;  %v257_v23 = vadd.f32 %v256_v18, %v237_v17  ;;  %v2036_v17 = vld [vmem:[%s2753_s7 + $0x6c] sm:$0xf0]  ;;  %v2035_v18 = vld [vmem:[%s2753_s7 + $0x6c] sm:$0xf] }
 0x131   :  { %v359_v30 = vpop.f32.mrf.mxu1  ;;  %v374_v36 = vadd.f32 %v373_v19, %v354_v13  ;;  %v1868_v13 = vld [vmem:[%s2753_s7 + $0x80] sm:$0xf0] }
 0x132   :  { %v1871_v14 = vor.u32 %v2037_v11, %v1868_v13 }
 0x133   :  { %v390_v39 = vpack.c.bf16 %v374_v36, %v372_v38  ;;  %v1844_v36 = vld [vmem:[%s2753_s7 + $0x50] sm:$0xf0] }
 0x136   :  { %v239_v21 = vpop.f32.mrf.mxu2 }
 0x137   :  { %v258_v22 = vpop.f32.mrf.mxu3 }
 0x138   :  { %v259_v24 = vadd.f32 %v258_v22, %v239_v21  ;;  %v376_v25 = vpop.f32.mrf.mxu0  ;;  %v1860_v21 = vld [vmem:[%s2753_s7 + $0x70] sm:$0xf0] }
 0x139   :  { %v377_v32 = vadd.f32 %v376_v25, %v357_v20  ;;  %v1859_v20 = vor.u32 %v2036_v17, %v1858_v16  ;;  %v1863_v22 = vor.u32 %v2035_v18, %v1860_v21  ;;  %v2033_v25 = vld [vmem:[%s2753_s7 + $0x5c] sm:$0xf] }
 0x13a   :  { %v270_v27 = vpack.c.bf16 %v259_v24, %v257_v23  ;;  %v1850_v23 = vld [vmem:[%s2753_s7 + $0x58] sm:$0xf]  ;;  %v2034_v24 = vld [vmem:[%s2753_s7 + $0x5c] sm:$0xf0] }
 0x13b   :  { %v1851_v26 = vor.u32 %v2034_v24, %v1850_v23 }
 0x13c   :  { %492 = vmatpush.bf16.msrb.mxu2 %v270_v27  ;;  %v1852_v27 = vld [vmem:[%s2753_s7 + $0x60] sm:$0xf0] }
 0x13f   :  { %v596_v35 = vpop.f32.mrf.mxu3 }
 0x140   :  { %493 = vmatpush.bf16.msrb.mxu2 %v269_v29  ;;  %v378_v31 = vpop.f32.mrf.mxu0  ;;  %v1855_v29 = vor.u32 %v2033_v25, %v1852_v27 }
 0x141   :  { %v379_v33 = vadd.f32 %v378_v31, %v359_v30  ;;  %v2394_v30 = vld [vmem:[%s2752_s4] ss:$0 sm:$0xff]  ;;  %v1842_v31 = vld [vmem:[%s2753_s7 + $0x48] sm:$0xf] }
 0x143   :  { %v391_v37 = vpack.c.bf16 %v379_v33, %v377_v32  ;;  %1708 = vmatmul.msk.bf16.vlgmr.msrb.gmra.mxu2 %vm412_vm3, %v1987_v34  ;;  %v2032_v32 = vld [vmem:[%s2753_s7 + $0x4c] sm:$0xf0]  ;;  %v2031_v33 = vld [vmem:[%s2753_s7 + $0x4c] sm:$0xf] }
 0x144   :  { %1026 = vmatpush.bf16.msra.mxu2 %v1018_v7 }
 0x145   :  { %431 = vmatpush.bf16.msra.mxu1 %v391_v37 }
 0x147   :  { %v598_v42 = vpop.f32.mrf.mxu3 }
 0x148   :  { %v615_v40 = vpop.f32.mrf.mxu0  ;;  %1027 = vmatpush.bf16.msra.mxu2 %v1867_v12 }
 0x149   :  { %432 = vmatpush.bf16.msra.mxu1 %v390_v39  ;;  %v616_v55 = vadd.f32 %v615_v40, %v596_v35  ;;  %v1843_v35 = vor.u32 %v2032_v32, %v1842_v31  ;;  %v1847_v39 = vor.u32 %v2031_v33, %v1844_v36 }
 0x14c   :  { %1688 = vmatmul.msk.bf16.vlgmr.msra.gmra.mxu1 %vm412_vm3, %v1999_v41  ;;  %1028 = vmatpush.bf16.msra.mxu2 %v1859_v20 }
 0x14f   :  { %v601_v45 = vpop.f32.mrf.mxu3 }
 0x150   :  { %v617_v44 = vpop.f32.mrf.mxu0  ;;  %1029 = vmatpush.bf16.msra.mxu2 %v1851_v26 }
 0x151   :  { %v618_v53 = vadd.f32 %v617_v44, %v598_v42 }
 0x153   :  { %1709 = vmatmul.msk.bf16.gmra.mxu2 %vm412_vm3, %v1988_v43  ;;  %v634_v56 = vpack.c.bf16 %v618_v53, %v616_v55 }
 0x154   :  { %1030 = vmatpush.bf16.msra.mxu2 %v1843_v35 }
 0x157   :  { %v603_v49 = vpop.f32.mrf.mxu3 }
 0x158   :  { %v620_v46 = vpop.f32.mrf.mxu0 }
 0x159   :  { %v621_v51 = vadd.f32 %v620_v46, %v601_v45 }
 0x15c   :  { %1689 = vmatmul.msk.bf16.gmra.mxu1 %vm412_vm3, %v2000_v47 }
 0x160   :  { %v622_v50 = vpop.f32.mrf.mxu0 }
 0x161   :  { %v623_v52 = vadd.f32 %v622_v50, %v603_v49 }
 0x163   :  { %v635_v54 = vpack.c.bf16 %v623_v52, %v621_v51  ;;  %1710 = vmatmul.msk.bf16.gmra.mxu2 %vm412_vm3, %v1989_v48 }
 0x165   :  { %674 = vmatpush.bf16.msra.mxu3 %v635_v54 }
 0x169   :  { %675 = vmatpush.bf16.msra.mxu3 %v634_v56 }
 0x16c   :  { %1787 = vmatmul.msk.bf16.vlgmr.msra.gmra.mxu3 %vm412_vm3, %v2011_v57  ;;  %1690 = vmatmul.msk.bf16.gmra.mxu1 %vm412_vm3, %v2001_v58 }
 0x16d   :  { %1055 = vmatpush.bf16.msrb.mxu3 %v1021_v8 }
 0x171   :  { %1056 = vmatpush.bf16.msrb.mxu3 %v1871_v14 }
 0x173   :  { %1711 = vmatmul.msk.bf16.gmra.mxu2 %vm412_vm3, %v1990_v59 }
 0x175   :  { %1057 = vmatpush.bf16.msrb.mxu3 %v1863_v22 }
 0x179   :  { %1058 = vmatpush.bf16.msrb.mxu3 %v1855_v29 }
 0x17c   :  { %1788 = vmatmul.msk.bf16.gmra.mxu3 %vm412_vm3, %v2012_v60  ;;  %1691 = vmatmul.msk.bf16.gmra.mxu1 %vm412_vm3, %v2002_v61 }
 0x17d   :  { %1059 = vmatpush.bf16.msrb.mxu3 %v1847_v39 }
 0x18c   :  { %1789 = vmatmul.msk.bf16.gmra.mxu3 %vm412_vm3, %v2013_v62 }
 0x19c   :  { %1790 = vmatmul.msk.bf16.gmra.mxu3 %vm412_vm3, %v2014_v63 }
 0x1c6   :  { %v495_v1 = vpop.f32.mrf.mxu2 }
 0x1c9   :  { %v434_v4 = vpop.f32.mrf.mxu1 }
 0x1ca   :  { %v496_v28 = vadd.f32 %v495_v1, %v434_v4 }
 0x1ce   :  { %v497_v15 = vpop.f32.mrf.mxu2 }
 0x1d1   :  { %v436_v19 = vpop.f32.mrf.mxu1 }
 0x1d2   :  { %v498_v43 = vadd.f32 %v497_v15, %v436_v19 }
 0x1d6   :  { %v500_v38 = vpop.f32.mrf.mxu2 }
 0x1d9   :  { %v439_v40 = vpop.f32.mrf.mxu1 }
 0x1da   :  { %v501_v52 = vadd.f32 %v500_v38, %v439_v40 }
 0x1de   :  { %v502_v50 = vpop.f32.mrf.mxu2 }
 0x1e1   :  { %v441_v51 = vpop.f32.mrf.mxu1 }
 0x1e2   :  { %v503_v1 = vadd.f32 %v502_v50, %v441_v51 }
 0x1e6   :  { %v505_v63 = vpop.f32.mrf.mxu2 }
 0x1e9   :  { %v444_v0 = vpop.f32.mrf.mxu1 }
 0x1ea   :  { %v506_v11 = vadd.f32 %v505_v63, %v444_v0 }
 0x1ee   :  { %v507_v17 = vpop.f32.mrf.mxu2 }
 0x1ef   :  { %v677_v34 = vpop.f32.mrf.mxu3 }
 0x1f0   :  { %v697_v37 = vadd.f32 %v677_v34, %v496_v28 }
 0x1f1   :  { %v446_v19 = vpop.f32.mrf.mxu1 }
 0x1f2   :  { %v709_v41 = vadd.f32 %v2394_v30, %v697_v37  ;;  %v508_v31 = vadd.f32 %v507_v17, %v446_v19 }
 0x1f4   :  { %v725_v42 = vmul.f32 0.044715, %v709_v41  ;;  %v717_v13 = vmul.f32 0.5, %v709_v41 }
 0x1f6   :  { %v733_v44 = vmul.f32 %v725_v42, %v709_v41  ;;  %v510_v38 = vpop.f32.mrf.mxu2 }
 0x1f7   :  { %v679_v45 = vpop.f32.mrf.mxu3 }
 0x1f8   :  { %v741_v46 = vmul.f32 %v733_v44, %v709_v41  ;;  %v698_v47 = vadd.f32 %v679_v45, %v498_v43 }
 0x1f9   :  { %v449_v37 = vpop.f32.mrf.mxu1 }
 0x1fa   :  { %v749_v48 = vadd.f32 %v741_v46, %v709_v41  ;;  %v710_v49 = vadd.f32 %v2394_v30, %v698_v47  ;;  %v511_v43 = vadd.f32 %v510_v38, %v449_v37  ;;  %v947_v37 = vld [vmem:[%s2753_s7 + $0x40] sm:$0x33]  ;;  %v1928_v38 = vld [vmem:[%s2753_s7 + $0xd0] sm:$0x33] }
 0x1fc   :  { %v726_v53 = vmul.f32 0.044715, %v710_v49  ;;  %v757_v54 = vmul.f32 0.7978846, %v749_v48  ;;  %v718_v14 = vmul.f32 0.5, %v710_v49 }
 0x1fe   :  { %v734_v55 = vmul.f32 %v726_v53, %v710_v49  ;;  %2056 = vtanh.f32 %v757_v54 }
 0x1ff   :  { %v682_v56 = vpop.f32.mrf.mxu3 }
 0x200   :  { %v742_v57 = vmul.f32 %v734_v55, %v710_v49  ;;  %v699_v58 = vadd.f32 %v682_v56, %v501_v52 }
 0x202   :  { %v750_v59 = vadd.f32 %v742_v57, %v710_v49  ;;  %v711_v60 = vadd.f32 %v2394_v30, %v699_v58  ;;  %v451_v58 = vpop.f32.mrf.mxu1 }
 0x204   :  { %v758_v61 = vmul.f32 0.7978846, %v750_v59  ;;  %v727_v62 = vmul.f32 0.044715, %v711_v60  ;;  %v2057_v4 = vpop.eup %2056  ;;  %v719_v45 = vmul.f32 0.5, %v711_v60  ;;  %v512_v59 = vpop.f32.mrf.mxu2 }
 0x205   :  { %v773_v9 = vadd.f32 1.0, %v2057_v4 }
 0x206   :  { %2058 = vtanh.f32 %v758_v61  ;;  %v735_v2 = vmul.f32 %v727_v62, %v711_v60  ;;  %v513_v62 = vadd.f32 %v512_v59, %v451_v58  ;;  %v2046_v58 = vld [vmem:[%s2753_s7 + $0xc4] sm:$0xf0]  ;;  %v2045_v59 = vld [vmem:[%s2753_s7 + $0xc4] sm:$0xf] }
 0x207   :  { %v684_v3 = vpop.f32.mrf.mxu3  ;;  %v781_v21 = vmul.f32 %v773_v9, %v717_v13 }
 0x208   :  { %v743_v5 = vmul.f32 %v735_v2, %v711_v60  ;;  %v700_v6 = vadd.f32 %v684_v3, %v503_v1 }
 0x20a   :  { %v712_v7 = vadd.f32 %v2394_v30, %v700_v6  ;;  %v751_v8 = vadd.f32 %v743_v5, %v711_v60 }
 0x20c   :  { %v2059_v10 = vpop.eup %2058  ;;  %v728_v12 = vmul.f32 0.044715, %v712_v7  ;;  %v759_v18 = vmul.f32 0.7978846, %v751_v8  ;;  %v720_v46 = vmul.f32 0.5, %v712_v7 }
 0x20d   :  { %v774_v15 = vadd.f32 1.0, %v2059_v10 }
 0x20e   :  { %v736_v16 = vmul.f32 %v728_v12, %v712_v7  ;;  %2060 = vtanh.f32 %v759_v18 }
 0x20f   :  { %v687_v20 = vpop.f32.mrf.mxu3  ;;  %v782_v22 = vmul.f32 %v774_v15, %v718_v14 }
 0x210   :  { %v744_v23 = vmul.f32 %v736_v16, %v712_v7  ;;  %v701_v24 = vadd.f32 %v687_v20, %v506_v11 }
 0x211   :  { %v2412_v25 = vpack.c.bf16 %v782_v22, %v781_v21 }
 0x212   :  { %v713_v26 = vadd.f32 %v2394_v30, %v701_v24  ;;  %v752_v27 = vadd.f32 %v744_v23, %v712_v7 }
 0x213   :  { %1872 = vmatmul.msk.bf16.vlgmr.msra.gmra.mxu2 %vm1003_vm5, %v2412_v25  ;;  %1876 = vmatmul.msk.bf16.vlgmr.msrb.gmra.mxu3 %vm1003_vm5, %v2412_v25 }
 0x214   :  { %v729_v28 = vmul.f32 0.044715, %v713_v26  ;;  %v760_v29 = vmul.f32 0.7978846, %v752_v27  ;;  %v2061_v34 = vpop.eup %2060  ;;  %v721_v9 = vmul.f32 0.5, %v713_v26 }
 0x215   :  { %v775_v41 = vadd.f32 1.0, %v2061_v34  ;;  %v2021_v34 = vld [vmem:[%s2755_s6 + $0x10] sm:$0xff] }
 0x216   :  { %v737_v32 = vmul.f32 %v729_v28, %v713_v26  ;;  %2062 = vtanh.f32 %v760_v29  ;;  %v2015_v29 = vld [vmem:[%s2754_s5] sm:$0xff] }
 0x217   :  { %v689_v33 = vpop.f32.mrf.mxu3  ;;  %v783_v51 = vmul.f32 %v775_v41, %v719_v45  ;;  %v1237_v41 = vunpack.c.l.b16 %v1928_v38 }
 0x218   :  { %v745_v35 = vmul.f32 %v737_v32, %v713_v26  ;;  %v702_v36 = vadd.f32 %v689_v33, %v508_v31  ;;  %v2019_v31 = vld [vmem:[%s2755_s6] sm:$0xff]  ;;  %v2016_v32 = vld [vmem:[%s2754_s5 + $0x8] sm:$0xff] }
 0x219   :  { %v2020_v33 = vld [vmem:[%s2755_s6 + $0x8] sm:$0xff]  ;;  %v1247_v45 = vpack.c.b16 %v1237_v41, %v1237_v41 }
 0x21a   :  { %v714_v39 = vadd.f32 %v2394_v30, %v702_v36  ;;  %v753_v40 = vadd.f32 %v745_v35, %v713_v26  ;;  %v2018_v35 = vld [vmem:[%s2754_s5 + $0x18] sm:$0xff] }
 0x21b   :  { %v2022_v36 = vld [vmem:[%s2755_s6 + $0x18] sm:$0xff] }
 0x21c   :  { %v2063_v42 = vpop.eup %2062  ;;  %v730_v44 = vmul.f32 0.044715, %v714_v39  ;;  %v761_v49 = vmul.f32 0.7978846, %v753_v40  ;;  %v722_v10 = vmul.f32 0.5, %v714_v39  ;;  %v1107_v40 = vunpack.c.h.b16 %v947_v37 }
 0x21d   :  { %v776_v47 = vadd.f32 1.0, %v2063_v42  ;;  %v1238_v42 = vunpack.c.h.b16 %v1928_v38 }
 0x21e   :  { %v738_v48 = vmul.f32 %v730_v44, %v714_v39  ;;  %2064 = vtanh.f32 %v761_v49  ;;  %v1117_v44 = vpack.c.b16 %v1107_v40, %v1107_v40  ;;  %v1270_v49 = vsel %vm1016_vm4, %v1247_v45, 0 }
 0x21f   :  { %v692_v50 = vpop.f32.mrf.mxu3  ;;  %v784_v52 = vmul.f32 %v776_v47, %v720_v46  ;;  %v1248_v46 = vpack.c.b16 %v1238_v42, %v1238_v42  ;;  %1278 = vmatpush.bf16.msrb.mxu2 %v1270_v49 }
 0x220   :  { %v746_v53 = vmul.f32 %v738_v48, %v714_v39  ;;  %v703_v54 = vadd.f32 %v692_v50, %v511_v43  ;;  %v1142_v48 = vsel %vm1016_vm4, %v1117_v44, 0 }
 0x221   :  { %v790_v55 = vpack.c.bf16 %v784_v52, %v783_v51  ;;  %v1273_v50 = vsel %vm1016_vm4, %v1248_v46, 0  ;;  %v1906_v51 = vld [vmem:[%s2753_s7 + $0x30] sm:$0xf]  ;;  %v2030_v52 = vld [vmem:[%s2753_s7 + $0x34] sm:$0xf0] }
 0x222   :  { %v715_v56 = vadd.f32 %v2394_v30, %v703_v54  ;;  %v754_v57 = vadd.f32 %v746_v53, %v714_v39  ;;  %v1106_v39 = vunpack.c.l.b16 %v947_v37  ;;  %v2029_v53 = vld [vmem:[%s2753_s7 + $0x34] sm:$0xf]  ;;  %v1908_v54 = vld [vmem:[%s2753_s7 + $0x38] sm:$0xf0]  ;;  %1307 = vmatpush.bf16.msra.mxu3 %v1273_v50 }
 0x223   :  { %1873 = vmatmul.msk.bf16.gmra.mxu2 %vm1003_vm5, %v790_v55  ;;  %1877 = vmatmul.msk.bf16.gmra.mxu3 %vm1003_vm5, %v790_v55 }
 0x224   :  { %v731_v60 = vmul.f32 0.044715, %v715_v56  ;;  %v762_v61 = vmul.f32 0.7978846, %v754_v57  ;;  %v2065_v1 = vpop.eup %2064  ;;  %v723_v22 = vmul.f32 0.5, %v715_v56  ;;  %v1116_v43 = vpack.c.b16 %v1106_v39, %v1106_v39 }
 0x225   :  { %v777_v6 = vadd.f32 1.0, %v2065_v1  ;;  %v1955_v57 = vld [vmem:[%s2753_s7 + $0xc0] sm:$0xf]  ;;  %v2027_v1 = vld [vmem:[%s2753_s7 + $0x24] sm:$0xf] }
 0x226   :  { %v739_v63 = vmul.f32 %v731_v60, %v715_v56  ;;  %2066 = vtanh.f32 %v762_v61  ;;  %v1139_v47 = vsel %vm1016_vm4, %v1116_v43, 0  ;;  %v1956_v60 = vor.u32 %v2046_v58, %v1955_v57  ;;  %v1957_v61 = vld [vmem:[%s2753_s7 + $0xc8] sm:$0xf0] }
 0x227   :  { %v694_v0 = vpop.f32.mrf.mxu3  ;;  %v785_v14 = vmul.f32 %v777_v6, %v721_v9  ;;  %v1949_v9 = vld [vmem:[%s2753_s7 + $0xb8] sm:$0xf0] }
 0x228   :  { %v747_v2 = vmul.f32 %v739_v63, %v715_v56  ;;  %v704_v3 = vadd.f32 %v694_v0, %v513_v62  ;;  %v1960_v62 = vor.u32 %v2045_v59, %v1957_v61  ;;  %1279 = vmatpush.bf16.msrb.mxu2 %v1956_v60  ;;  %v1898_v63 = vld [vmem:[%s2753_s7 + $0x20] sm:$0xf]  ;;  %v2028_v0 = vld [vmem:[%s2753_s7 + $0x24] sm:$0xf0] }
 0x22a   :  { %v716_v4 = vadd.f32 %v2394_v30, %v704_v3  ;;  %v755_v5 = vadd.f32 %v747_v2, %v715_v56  ;;  %v1911_v56 = vor.u32 %v2029_v53, %v1908_v54  ;;  %1308 = vmatpush.bf16.msra.mxu3 %v1960_v62  ;;  %v1899_v2 = vor.u32 %v2028_v0, %v1898_v63  ;;  %v1900_v3 = vld [vmem:[%s2753_s7 + $0x28] sm:$0xf0] }
 0x22b   :  { %v1903_v6 = vor.u32 %v2027_v1, %v1900_v3 }
 0x22c   :  { %v2067_v7 = vpop.eup %2066  ;;  %v732_v8 = vmul.f32 0.044715, %v716_v4  ;;  %v763_v13 = vmul.f32 0.7978846, %v755_v5  ;;  %v724_v23 = vmul.f32 0.5, %v716_v4 }
 0x22d   :  { %v778_v11 = vadd.f32 1.0, %v2067_v7  ;;  %v2044_v5 = vld [vmem:[%s2753_s7 + $0xb4] sm:$0xf0] }
 0x22e   :  { %v740_v12 = vmul.f32 %v732_v8, %v716_v4  ;;  %2068 = vtanh.f32 %v763_v13  ;;  %v2043_v8 = vld [vmem:[%s2753_s7 + $0xb4] sm:$0xf] }
 0x22f   :  { %v786_v15 = vmul.f32 %v778_v11, %v722_v10  ;;  %v1952_v10 = vor.u32 %v2043_v8, %v1949_v9  ;;  %v1890_v11 = vld [vmem:[%s2753_s7 + $0x10] sm:$0xf]  ;;  %v2025_v13 = vld [vmem:[%s2753_s7 + $0x14] sm:$0xf] }
 0x230   :  { %v748_v16 = vmul.f32 %v740_v12, %v716_v4  ;;  %v2026_v12 = vld [vmem:[%s2753_s7 + $0x14] sm:$0xf0] }
 0x231   :  { %v791_v17 = vpack.c.bf16 %v786_v15, %v785_v14  ;;  %v1891_v14 = vor.u32 %v2026_v12, %v1890_v11  ;;  %v1892_v15 = vld [vmem:[%s2753_s7 + $0x18] sm:$0xf0]  ;;  %1309 = vmatpush.bf16.msra.mxu3 %v1952_v10 }
 0x232   :  { %v756_v18 = vadd.f32 %v748_v16, %v716_v4  ;;  %v1947_v4 = vld [vmem:[%s2753_s7 + $0xb0] sm:$0xf]  ;;  %v1939_v16 = vld [vmem:[%s2753_s7 + $0xa0] sm:$0xf] }
 0x233   :  { %1874 = vmatmul.msk.bf16.gmra.mxu2 %vm1003_vm5, %v791_v17  ;;  %1878 = vmatmul.msk.bf16.gmra.mxu3 %vm1003_vm5, %v791_v17  ;;  %v1948_v7 = vor.u32 %v2044_v5, %v1947_v4 }
 0x234   :  { %v764_v30 = vmul.f32 0.7978846, %v756_v18  ;;  %v2069_v19 = vpop.eup %2068  ;;  %v1895_v18 = vor.u32 %v2025_v13, %v1892_v15  ;;  %v1349_v13 = vld [vmem:[%s2756_s8] sm:$0x3] }
 0x235   :  { %v779_v20 = vadd.f32 1.0, %v2069_v19  ;;  %1280 = vmatpush.bf16.msrb.mxu2 %v1948_v7  ;;  %v2041_v19 = vld [vmem:[%s2753_s7 + $0xa4] sm:$0xf] }
 0x236   :  { %2070 = vtanh.f32 %v764_v30 }
 0x237   :  { %v787_v26 = vmul.f32 %v779_v20, %v723_v22  ;;  %v1941_v20 = vld [vmem:[%s2753_s7 + $0xa8] sm:$0xf0]  ;;  %v1882_v22 = vld [vmem:[%s2753_s7] sm:$0xf] }
 0x23c   :  { %v2071_v21 = vpop.eup %2070 }
 0x23d   :  { %v780_v24 = vadd.f32 1.0, %v2071_v21  ;;  %v1944_v21 = vor.u32 %v2041_v19, %v1941_v20 }
 0x23f   :  { %v788_v27 = vmul.f32 %v780_v24, %v724_v23  ;;  %v2024_v23 = vld [vmem:[%s2753_s7 + $0x4] sm:$0xf0]  ;;  %v2023_v24 = vld [vmem:[%s2753_s7 + $0x4] sm:$0xf]  ;;  %1310 = vmatpush.bf16.msra.mxu3 %v1944_v21 }
 0x241   :  { %v792_v28 = vpack.c.bf16 %v788_v27, %v787_v26  ;;  %v1883_v26 = vor.u32 %v2024_v23, %v1882_v22  ;;  %v1884_v27 = vld [vmem:[%s2753_s7 + $0x8] sm:$0xf0] }
 0x243   :  { %837 = vmatpush.bf16.msra.mxu0 %v792_v28  ;;  %910 = vmatpush.bf16.msrb.mxu1 %v792_v28 }
 0x244   :  { %1875 = vmatmul.msk.bf16.gmra.mxu2 %vm1003_vm5, %v792_v28  ;;  %1879 = vmatmul.msk.bf16.gmra.mxu3 %vm1003_vm5, %v792_v28  ;;  %v1931_v28 = vld [vmem:[%s2753_s7 + $0x90] sm:$0xf] }
 0x247   :  { %838 = vmatpush.bf16.msra.mxu0 %v791_v17  ;;  %911 = vmatpush.bf16.msrb.mxu1 %v791_v17  ;;  %v2042_v17 = vld [vmem:[%s2753_s7 + $0xa4] sm:$0xf0] }
 0x248   :  { %v1940_v30 = vor.u32 %v2042_v17, %v1939_v16  ;;  %v2607_v16 = vperm.slane %v1349_v13, 0  ;;  %v2609_v17 = vperm.slane %v1349_v13, 1 }
 0x24a   :  { %1281 = vmatpush.bf16.msrb.mxu2 %v1940_v30 }
 0x24b   :  { %839 = vmatpush.bf16.msra.mxu0 %v790_v55  ;;  %912 = vmatpush.bf16.msrb.mxu1 %v790_v55  ;;  %v1907_v55 = vor.u32 %v2030_v52, %v1906_v51 }
 0x24f   :  { %840 = vmatpush.bf16.msra.mxu0 %v2412_v25  ;;  %913 = vmatpush.bf16.msrb.mxu1 %v2412_v25  ;;  %v2017_v25 = vld [vmem:[%s2754_s5 + $0x10] sm:$0xff] }
 0x252   :  { %1807 = vmatmul.msk.bf16.vlgmr.msra.gmra.mxu0 %vm95_vm0, %v2015_v29  ;;  %1827 = vmatmul.msk.bf16.vlgmr.msrb.gmra.mxu1 %vm95_vm0, %v2019_v31  ;;  %v2040_v29 = vld [vmem:[%s2753_s7 + $0x94] sm:$0xf0]  ;;  %v1887_v31 = vor.u32 %v2023_v24, %v1884_v27 }
 0x253   :  { %1147 = vmatpush.bf16.msrb.mxu0 %v1139_v47  ;;  %1176 = vmatpush.bf16.msra.mxu1 %v1142_v48 }
 0x257   :  { %1148 = vmatpush.bf16.msrb.mxu0 %v1907_v55  ;;  %1177 = vmatpush.bf16.msra.mxu1 %v1911_v56 }
 0x25b   :  { %1149 = vmatpush.bf16.msrb.mxu0 %v1899_v2  ;;  %1178 = vmatpush.bf16.msra.mxu1 %v1903_v6 }
 0x25f   :  { %1150 = vmatpush.bf16.msrb.mxu0 %v1891_v14  ;;  %1179 = vmatpush.bf16.msra.mxu1 %v1895_v18 }
 0x262   :  { %1808 = vmatmul.msk.bf16.gmra.mxu0 %vm95_vm0, %v2016_v32  ;;  %1828 = vmatmul.msk.bf16.gmra.mxu1 %vm95_vm0, %v2020_v33  ;;  %v1932_v32 = vor.u32 %v2040_v29, %v1931_v28  ;;  %v2039_v33 = vld [vmem:[%s2753_s7 + $0x94] sm:$0xf] }
 0x263   :  { %1151 = vmatpush.bf16.msrb.mxu0 %v1883_v26  ;;  %1180 = vmatpush.bf16.msra.mxu1 %v1887_v31 }
 0x264   :  { %1282 = vmatpush.bf16.msrb.mxu2 %v1932_v32 }
 0x272   :  { %1809 = vmatmul.msk.bf16.gmra.mxu0 %vm95_vm0, %v2017_v25  ;;  %1829 = vmatmul.msk.bf16.gmra.mxu1 %vm95_vm0, %v2021_v34  ;;  %v1933_v25 = vld [vmem:[%s2753_s7 + $0x98] sm:$0xf0] }
 0x273   :  { %v1936_v34 = vor.u32 %v2039_v33, %v1933_v25 }
 0x275   :  { %1311 = vmatpush.bf16.msra.mxu3 %v1936_v34 }
 0x282   :  { %1810 = vmatmul.msk.bf16.gmra.mxu0 %vm95_vm0, %v2018_v35  ;;  %1830 = vmatmul.msk.bf16.gmra.mxu1 %vm95_vm0, %v2022_v36 }
 0x296   :  { %v1032_v59 = vpop.f32.mrf.mxu2  ;;  %v1061_v60 = vpop.f32.mrf.mxu3 }
 0x29e   :  { %v1034_v61 = vpop.f32.mrf.mxu2  ;;  %v1063_v62 = vpop.f32.mrf.mxu3 }
 0x2a6   :  { %v1037_v63 = vpop.f32.mrf.mxu2  ;;  %v1066_v0 = vpop.f32.mrf.mxu3 }
 0x2ae   :  { %v2584_v1 = vpop.f32.mrf.mxu2  ;;  %v2586_v2 = vpop.f32.mrf.mxu3 }
 0x2b6   :  { %v2588_v3 = vpop.f32.mrf.mxu2  ;;  %v2590_v4 = vpop.f32.mrf.mxu3 }
 0x2be   :  { %v2592_v5 = vpop.f32.mrf.mxu2  ;;  %v2594_v6 = vpop.f32.mrf.mxu3 }
 0x2c7   :  { %v2596_v7 = vpop.f32.mrf.mxu2  ;;  %v2598_v8 = vpop.f32.mrf.mxu3 }
 0x2cf   :  { %v842_v35 = vpop.f32.mrf.mxu0  ;;  %v915_v36 = vpop.f32.mrf.mxu1 }
 0x2d0   :  { %v2600_v9 = vpop.f32.mrf.mxu2  ;;  %v2602_v10 = vpop.f32.mrf.mxu3 }
 0x2d7   :  { %v844_v37 = vpop.f32.mrf.mxu0  ;;  %v917_v38 = vpop.f32.mrf.mxu1 }
 0x2d8   :  { %v862_v39 = vpack.c.bf16 %v844_v37, %v842_v35  ;;  %v935_v40 = vpack.c.bf16 %v917_v38, %v915_v36 }
 0x2da   :  { %1912 = vmatmul.msk.bf16.vlgmr.msrb.gmra.mxu0 %vm1003_vm5, %v862_v39  ;;  %1916 = vmatmul.msk.bf16.vlgmr.msra.gmra.mxu1 %vm1003_vm5, %v862_v39 }
 0x2db   :  { %1961 = vmatmul.msk.bf16.vlgmr.msrb.gmra.mxu2 %vm1003_vm5, %v935_v40  ;;  %1965 = vmatmul.msk.bf16.vlgmr.msra.gmra.mxu3 %vm1003_vm5, %v935_v40 }
 0x2df   :  { %v847_v41 = vpop.f32.mrf.mxu0  ;;  %v920_v42 = vpop.f32.mrf.mxu1 }
 0x2e7   :  { %v849_v43 = vpop.f32.mrf.mxu0  ;;  %v922_v44 = vpop.f32.mrf.mxu1 }
 0x2e8   :  { %v863_v45 = vpack.c.bf16 %v849_v43, %v847_v41  ;;  %v936_v46 = vpack.c.bf16 %v922_v44, %v920_v42 }
 0x2ea   :  { %1913 = vmatmul.msk.bf16.gmra.mxu0 %vm1003_vm5, %v863_v45  ;;  %1917 = vmatmul.msk.bf16.gmra.mxu1 %vm1003_vm5, %v863_v45 }
 0x2eb   :  { %1962 = vmatmul.msk.bf16.gmra.mxu2 %vm1003_vm5, %v936_v46  ;;  %1966 = vmatmul.msk.bf16.gmra.mxu3 %vm1003_vm5, %v936_v46 }
 0x2ef   :  { %v852_v47 = vpop.f32.mrf.mxu0  ;;  %v925_v48 = vpop.f32.mrf.mxu1 }
 0x2f7   :  { %v854_v49 = vpop.f32.mrf.mxu0  ;;  %v927_v50 = vpop.f32.mrf.mxu1 }
 0x2f8   :  { %v864_v51 = vpack.c.bf16 %v854_v49, %v852_v47  ;;  %v937_v52 = vpack.c.bf16 %v927_v50, %v925_v48 }
 0x2fa   :  { %1914 = vmatmul.msk.bf16.gmra.mxu0 %vm1003_vm5, %v864_v51  ;;  %1918 = vmatmul.msk.bf16.gmra.mxu1 %vm1003_vm5, %v864_v51 }
 0x2fb   :  { %1963 = vmatmul.msk.bf16.gmra.mxu2 %vm1003_vm5, %v937_v52  ;;  %1967 = vmatmul.msk.bf16.gmra.mxu3 %vm1003_vm5, %v937_v52 }
 0x2ff   :  { %v857_v53 = vpop.f32.mrf.mxu0  ;;  %v930_v54 = vpop.f32.mrf.mxu1 }
 0x307   :  { %v859_v55 = vpop.f32.mrf.mxu0  ;;  %v932_v56 = vpop.f32.mrf.mxu1 }
 0x308   :  { %v865_v57 = vpack.c.bf16 %v859_v55, %v857_v53  ;;  %v938_v58 = vpack.c.bf16 %v932_v56, %v930_v54 }
 0x30a   :  { %1915 = vmatmul.msk.bf16.gmra.mxu0 %vm1003_vm5, %v865_v57  ;;  %1919 = vmatmul.msk.bf16.gmra.mxu1 %vm1003_vm5, %v865_v57 }
 0x30b   :  { %1964 = vmatmul.msk.bf16.gmra.mxu2 %vm1003_vm5, %v938_v58  ;;  %1968 = vmatmul.msk.bf16.gmra.mxu3 %vm1003_vm5, %v938_v58 }
 0x357   :  { %v1153_v11 = vpop.f32.mrf.mxu0  ;;  %v1182_v12 = vpop.f32.mrf.mxu1 }
 0x358   :  { %v1154_v14 = vadd.f32 %v1153_v11, %v1032_v59  ;;  %v1183_v15 = vadd.f32 %v1182_v12, %v1061_v60 }
 0x35e   :  { %v1284_v18 = vpop.f32.mrf.mxu2  ;;  %v1313_v30 = vpop.f32.mrf.mxu3 }
 0x35f   :  { %v1333_v19 = vadd.f32 %v1284_v18, %v1154_v14  ;;  %v1334_v20 = vadd.f32 %v1313_v30, %v1183_v15  ;;  %v1155_v21 = vpop.f32.mrf.mxu0  ;;  %v1184_v22 = vpop.f32.mrf.mxu1 }
 0x360   :  { %v1156_v31 = vadd.f32 %v1155_v21, %v1034_v61  ;;  %v1185_v32 = vadd.f32 %v1184_v22, %v1063_v62 }
 0x361   :  { %v1355_v23 = vadd.f32 %v2607_v16, %v1333_v19  ;;  %v1356_v24 = vadd.f32 %v2609_v17, %v1334_v20 }
 0x363   :  { %v1387_v26 = vmul.f32 0.044715, %v1355_v23  ;;  %v1388_v27 = vmul.f32 0.044715, %v1356_v24  ;;  %v1371_v14 = vmul.f32 0.5, %v1355_v23  ;;  %v1372_v19 = vmul.f32 0.5, %v1356_v24 }
 0x365   :  { %v1403_v28 = vmul.f32 %v1387_v26, %v1355_v23  ;;  %v1404_v29 = vmul.f32 %v1388_v27, %v1356_v24 }
 0x366   :  { %v1286_v33 = vpop.f32.mrf.mxu2  ;;  %v1315_v25 = vpop.f32.mrf.mxu3 }
 0x367   :  { %v1419_v34 = vmul.f32 %v1403_v28, %v1355_v23  ;;  %v1420_v35 = vmul.f32 %v1404_v29, %v1356_v24  ;;  %v1335_v36 = vadd.f32 %v1286_v33, %v1156_v31  ;;  %v1336_v37 = vadd.f32 %v1315_v25, %v1185_v32  ;;  %v1158_v38 = vpop.f32.mrf.mxu0  ;;  %v1187_v39 = vpop.f32.mrf.mxu1 }
 0x368   :  { %v1159_v48 = vadd.f32 %v1158_v38, %v1037_v63  ;;  %v1188_v49 = vadd.f32 %v1187_v39, %v1066_v0 }
 0x369   :  { %v1435_v40 = vadd.f32 %v1419_v34, %v1355_v23  ;;  %v1436_v41 = vadd.f32 %v1420_v35, %v1356_v24  ;;  %v1357_v42 = vadd.f32 %v2607_v16, %v1335_v36  ;;  %v1358_v43 = vadd.f32 %v2609_v17, %v1336_v37 }
 0x36b   :  { %v1451_v44 = vmul.f32 0.7978846, %v1435_v40  ;;  %v1452_v45 = vmul.f32 0.7978846, %v1436_v41  ;;  %v1389_v46 = vmul.f32 0.044715, %v1357_v42 }
 0x36c   :  { %v1390_v47 = vmul.f32 0.044715, %v1358_v43  ;;  %v1373_v41 = vmul.f32 0.5, %v1357_v42 }
 0x36d   :  { %2072 = vtanh.f32 %v1451_v44  ;;  %v1405_v50 = vmul.f32 %v1389_v46, %v1357_v42  ;;  %v1374_v44 = vmul.f32 0.5, %v1358_v43 }
 0x36e   :  { %2074 = vtanh.f32 %v1452_v45  ;;  %v1406_v51 = vmul.f32 %v1390_v47, %v1358_v43  ;;  %v1289_v52 = vpop.f32.mrf.mxu2  ;;  %v1318_v53 = vpop.f32.mrf.mxu3 }
 0x36f   :  { %v1337_v54 = vadd.f32 %v1289_v52, %v1159_v48  ;;  %v1338_v55 = vadd.f32 %v1318_v53, %v1188_v49  ;;  %v1160_v56 = vpop.f32.mrf.mxu0  ;;  %v1189_v57 = vpop.f32.mrf.mxu1  ;;  %v1421_v58 = vmul.f32 %v1405_v50, %v1357_v42 }
 0x370   :  { %v1422_v59 = vmul.f32 %v1406_v51, %v1358_v43  ;;  %v1161_v27 = vadd.f32 %v1160_v56, %v2584_v1  ;;  %v1190_v28 = vadd.f32 %v1189_v57, %v2586_v2 }
 0x371   :  { %v2616_v60 = vadd.f32 %v2607_v16, %v1337_v54  ;;  %v2619_v61 = vadd.f32 %v2609_v17, %v1338_v55  ;;  %v1437_v62 = vadd.f32 %v1421_v58, %v1357_v42 }
 0x372   :  { %v1438_v63 = vadd.f32 %v1422_v59, %v1358_v43 }
 0x373   :  { %v2073_v0 = vpop.eup %2072  ;;  %v1391_v11 = vmul.f32 0.044715, %v2616_v60  ;;  %v1392_v12 = vmul.f32 0.044715, %v2619_v61  ;;  %v1453_v18 = vmul.f32 0.7978846, %v1437_v62 }
 0x374   :  { %v2075_v13 = vpop.eup %2074  ;;  %v1483_v15 = vadd.f32 1.0, %v2073_v0  ;;  %v1454_v30 = vmul.f32 0.7978846, %v1438_v63 }
 0x375   :  { %v1484_v20 = vadd.f32 1.0, %v2075_v13  ;;  %v1407_v21 = vmul.f32 %v1391_v11, %v2616_v60  ;;  %v1408_v22 = vmul.f32 %v1392_v12, %v2619_v61  ;;  %2076 = vtanh.f32 %v1453_v18 }
 0x376   :  { %v1499_v26 = vmul.f32 %v1483_v15, %v1371_v14  ;;  %v1291_v29 = vpop.f32.mrf.mxu2  ;;  %v1320_v31 = vpop.f32.mrf.mxu3  ;;  %2078 = vtanh.f32 %v1454_v30  ;;  %v1375_v18 = vmul.f32 0.5, %v2616_v60 }
 0x377   :  { %v1500_v32 = vmul.f32 %v1484_v20, %v1372_v19  ;;  %v1423_v23 = vmul.f32 %v1407_v21, %v2616_v60  ;;  %v1424_v33 = vmul.f32 %v1408_v22, %v2619_v61  ;;  %v1163_v24 = vpop.f32.mrf.mxu0  ;;  %v1192_v25 = vpop.f32.mrf.mxu1  ;;  %v1339_v34 = vadd.f32 %v1291_v29, %v1161_v27 }
 0x378   :  { %1515 = vst [vmem:[%s2757_s9] sm:$0xff] %v1499_v26  ;;  %v1340_v35 = vadd.f32 %v1320_v31, %v1190_v28  ;;  %v1164_v49 = vadd.f32 %v1163_v24, %v2588_v3  ;;  %v1193_v50 = vadd.f32 %v1192_v25, %v2590_v4  ;;  %v1376_v21 = vmul.f32 0.5, %v2619_v61 }
 0x379   :  { %1516 = vst [vmem:[%s2757_s9 + $0x8] sm:$0xff] %v1500_v32  ;;  %v1439_v1 = vadd.f32 %v1423_v23, %v2616_v60  ;;  %v1440_v2 = vadd.f32 %v1424_v33, %v2619_v61  ;;  %v2638_v36 = vadd.f32 %v2607_v16, %v1339_v34 }
 0x37a   :  { %v2641_v37 = vadd.f32 %v2609_v17, %v1340_v35 }
 0x37b   :  { %v1455_v38 = vmul.f32 0.7978846, %v1439_v1  ;;  %v1456_v39 = vmul.f32 0.7978846, %v1440_v2  ;;  %v2077_v40 = vpop.eup %2076  ;;  %v1393_v45 = vmul.f32 0.044715, %v2638_v36 }
 0x37c   :  { %v1394_v46 = vmul.f32 0.044715, %v2641_v37  ;;  %v2079_v47 = vpop.eup %2078  ;;  %v1485_v48 = vadd.f32 1.0, %v2077_v40 }
 0x37d   :  { %2080 = vtanh.f32 %v1455_v38  ;;  %v1486_v51 = vadd.f32 1.0, %v2079_v47  ;;  %v1409_v52 = vmul.f32 %v1393_v45, %v2638_v36 }
 0x37e   :  { %2082 = vtanh.f32 %v1456_v39  ;;  %v1410_v53 = vmul.f32 %v1394_v46, %v2641_v37  ;;  %v1294_v54 = vpop.f32.mrf.mxu2  ;;  %v1323_v42 = vpop.f32.mrf.mxu3  ;;  %v1501_v43 = vmul.f32 %v1485_v48, %v1373_v41  ;;  %v1377_v41 = vmul.f32 0.5, %v2638_v36 }
 0x37f   :  { %v1341_v55 = vadd.f32 %v1294_v54, %v1164_v49  ;;  %v1342_v56 = vadd.f32 %v1323_v42, %v1193_v50  ;;  %v1165_v57 = vpop.f32.mrf.mxu0  ;;  %v1194_v58 = vpop.f32.mrf.mxu1  ;;  %v1502_v59 = vmul.f32 %v1486_v51, %v1374_v44  ;;  %v1425_v62 = vmul.f32 %v1409_v52, %v2638_v36 }
 0x380   :  { %v1426_v3 = vmul.f32 %v1410_v53, %v2641_v37  ;;  %1517 = vst [vmem:[%s2757_s9 + $0x10] sm:$0xff] %v1501_v43  ;;  %v1166_v29 = vadd.f32 %v1165_v57, %v2592_v5  ;;  %v1195_v31 = vadd.f32 %v1194_v58, %v2594_v6  ;;  %v1378_v44 = vmul.f32 0.5, %v2641_v37 }
 0x381   :  { %v2655_v4 = vadd.f32 %v2607_v16, %v1341_v55  ;;  %v2658_v63 = vadd.f32 %v2609_v17, %v1342_v56  ;;  %1518 = vst [vmem:[%s2757_s9 + $0x18] sm:$0xff] %v1502_v59  ;;  %v1441_v0 = vadd.f32 %v1425_v62, %v2638_v36 }
 0x382   :  { %v1442_v11 = vadd.f32 %v1426_v3, %v2641_v37 }
 0x383   :  { %v2081_v12 = vpop.eup %2080  ;;  %v1395_v13 = vmul.f32 0.044715, %v2655_v4  ;;  %v1396_v14 = vmul.f32 0.044715, %v2658_v63  ;;  %v1457_v19 = vmul.f32 0.7978846, %v1441_v0 }
 0x384   :  { %v2083_v15 = vpop.eup %2082  ;;  %v1487_v30 = vadd.f32 1.0, %v2081_v12  ;;  %v1458_v20 = vmul.f32 0.7978846, %v1442_v11 }
 0x385   :  { %v1488_v22 = vadd.f32 1.0, %v2083_v15  ;;  %v1411_v26 = vmul.f32 %v1395_v13, %v2655_v4  ;;  %v1412_v27 = vmul.f32 %v1396_v14, %v2658_v63  ;;  %2084 = vtanh.f32 %v1457_v19 }
 0x386   :  { %v1503_v28 = vmul.f32 %v1487_v30, %v1375_v18  ;;  %v1296_v32 = vpop.f32.mrf.mxu2  ;;  %v1325_v23 = vpop.f32.mrf.mxu3  ;;  %2086 = vtanh.f32 %v1458_v20  ;;  %v1379_v14 = vmul.f32 0.5, %v2655_v4  ;;  %v1380_v19 = vmul.f32 0.5, %v2658_v63 }
 0x387   :  { %v1504_v33 = vmul.f32 %v1488_v22, %v1376_v21  ;;  %v1427_v60 = vmul.f32 %v1411_v26, %v2655_v4  ;;  %v1428_v24 = vmul.f32 %v1412_v27, %v2658_v63  ;;  %v1343_v61 = vadd.f32 %v1296_v32, %v1166_v29  ;;  %v1168_v34 = vpop.f32.mrf.mxu0  ;;  %v1197_v35 = vpop.f32.mrf.mxu1 }
 0x388   :  { %1519 = vst [vmem:[%s2757_s9 + $0x20] sm:$0xff] %v1503_v28  ;;  %v1344_v25 = vadd.f32 %v1325_v23, %v1195_v31  ;;  %v1169_v49 = vadd.f32 %v1168_v34, %v2596_v7  ;;  %v1198_v50 = vadd.f32 %v1197_v35, %v2598_v8 }
 0x389   :  { %1520 = vst [vmem:[%s2757_s9 + $0x28] sm:$0xff] %v1504_v33  ;;  %v1443_v5 = vadd.f32 %v1427_v60, %v2655_v4  ;;  %v1444_v6 = vadd.f32 %v1428_v24, %v2658_v63  ;;  %v2684_v1 = vadd.f32 %v2607_v16, %v1343_v61 }
 0x38a   :  { %v2687_v2 = vadd.f32 %v2609_v17, %v1344_v25 }
 0x38b   :  { %v1459_v38 = vmul.f32 0.7978846, %v1443_v5  ;;  %v1460_v39 = vmul.f32 0.7978846, %v1444_v6  ;;  %v2085_v40 = vpop.eup %2084  ;;  %v1397_v45 = vmul.f32 0.044715, %v2684_v1 }
 0x38c   :  { %v1398_v46 = vmul.f32 0.044715, %v2687_v2  ;;  %v2087_v47 = vpop.eup %2086  ;;  %v1489_v48 = vadd.f32 1.0, %v2085_v40  ;;  %v1382_v40 = vmul.f32 0.5, %v2687_v2 }
 0x38d   :  { %2088 = vtanh.f32 %v1459_v38  ;;  %v1490_v51 = vadd.f32 1.0, %v2087_v47  ;;  %v1413_v52 = vmul.f32 %v1397_v45, %v2684_v1  ;;  %v1381_v38 = vmul.f32 0.5, %v2684_v1 }
 0x38e   :  { %2090 = vtanh.f32 %v1460_v39  ;;  %v1414_v53 = vmul.f32 %v1398_v46, %v2687_v2  ;;  %v1299_v36 = vpop.f32.mrf.mxu2  ;;  %v1328_v54 = vpop.f32.mrf.mxu3  ;;  %v1505_v37 = vmul.f32 %v1489_v48, %v1377_v41 }
 0x38f   :  { %v1345_v42 = vadd.f32 %v1299_v36, %v1169_v49  ;;  %v1346_v43 = vadd.f32 %v1328_v54, %v1198_v50  ;;  %v1506_v55 = vmul.f32 %v1490_v51, %v1378_v44  ;;  %v1429_v56 = vmul.f32 %v1413_v52, %v2684_v1  ;;  %v1170_v11 = vpop.f32.mrf.mxu0  ;;  %v1199_v12 = vpop.f32.mrf.mxu1 }
 0x390   :  { %v1430_v57 = vmul.f32 %v1414_v53, %v2687_v2  ;;  %1521 = vst [vmem:[%s2757_s9 + $0x30] sm:$0xff] %v1505_v37  ;;  %v1171_v27 = vadd.f32 %v1170_v11, %v2600_v9  ;;  %v1200_v28 = vadd.f32 %v1199_v12, %v2602_v10 }
 0x391   :  { %v1367_v7 = vadd.f32 %v2607_v16, %v1345_v42  ;;  %v2704_v8 = vadd.f32 %v2609_v17, %v1346_v43  ;;  %1522 = vst [vmem:[%s2757_s9 + $0x38] sm:$0xff] %v1506_v55  ;;  %v1445_v58 = vadd.f32 %v1429_v56, %v2684_v1 }
 0x392   :  { %v1446_v59 = vadd.f32 %v1430_v57, %v2687_v2 }
 0x393   :  { %v2089_v62 = vpop.eup %2088  ;;  %v1399_v3 = vmul.f32 0.044715, %v1367_v7  ;;  %v1400_v0 = vmul.f32 0.044715, %v2704_v8  ;;  %v1461_v18 = vmul.f32 0.7978846, %v1445_v58 }
 0x394   :  { %v2091_v13 = vpop.eup %2090  ;;  %v1491_v15 = vadd.f32 1.0, %v2089_v62  ;;  %v1462_v30 = vmul.f32 0.7978846, %v1446_v59  ;;  %v1383_v50 = vmul.f32 0.5, %v1367_v7  ;;  %v1384_v36 = vmul.f32 0.5, %v2704_v8 }
 0x395   :  { %v1492_v20 = vadd.f32 1.0, %v2091_v13  ;;  %v1415_v21 = vmul.f32 %v1399_v3, %v1367_v7  ;;  %v1416_v22 = vmul.f32 %v1400_v0, %v2704_v8  ;;  %2092 = vtanh.f32 %v1461_v18 }
 0x396   :  { %v1507_v26 = vmul.f32 %v1491_v15, %v1379_v14  ;;  %v1301_v29 = vpop.f32.mrf.mxu2  ;;  %v1330_v31 = vpop.f32.mrf.mxu3  ;;  %2094 = vtanh.f32 %v1462_v30 }
 0x397   :  { %v1508_v32 = vmul.f32 %v1492_v20, %v1380_v19  ;;  %v1431_v4 = vmul.f32 %v1415_v21, %v1367_v7  ;;  %v1432_v23 = vmul.f32 %v1416_v22, %v2704_v8  ;;  %v1347_v63 = vadd.f32 %v1301_v29, %v1171_v27 }
 0x398   :  { %1523 = vst [vmem:[%s2757_s9 + $0x40] sm:$0xff] %v1507_v26  ;;  %v1348_v33 = vadd.f32 %v1330_v31, %v1200_v28 }
 0x399   :  { %1524 = vst [vmem:[%s2757_s9 + $0x48] sm:$0xff] %v1508_v32  ;;  %v1447_v9 = vadd.f32 %v1431_v4, %v1367_v7  ;;  %v1448_v10 = vadd.f32 %v1432_v23, %v2704_v8  ;;  %v1369_v60 = vadd.f32 %v2607_v16, %v1347_v63 }
 0x39a   :  { %v1370_v24 = vadd.f32 %v2609_v17, %v1348_v33 }
 0x39b   :  { %v1463_v61 = vmul.f32 0.7978846, %v1447_v9  ;;  %v1464_v25 = vmul.f32 0.7978846, %v1448_v10  ;;  %v2093_v5 = vpop.eup %2092  ;;  %v1401_v6 = vmul.f32 0.044715, %v1369_v60 }
 0x39c   :  { %v1402_v34 = vmul.f32 0.044715, %v1370_v24  ;;  %v2095_v35 = vpop.eup %2094  ;;  %v1493_v39 = vadd.f32 1.0, %v2093_v5  ;;  %v1385_v56 = vmul.f32 0.5, %v1369_v60  ;;  %v1386_v7 = vmul.f32 0.5, %v1370_v24 }
 0x39d   :  { %2096 = vtanh.f32 %v1463_v61  ;;  %v1494_v41 = vadd.f32 1.0, %v2095_v35  ;;  %v1417_v44 = vmul.f32 %v1401_v6, %v1369_v60 }
 0x39e   :  { %2098 = vtanh.f32 %v1464_v25  ;;  %v1418_v45 = vmul.f32 %v1402_v34, %v1370_v24  ;;  %v1509_v46 = vmul.f32 %v1493_v39, %v1381_v38 }
 0x39f   :  { %v1510_v16 = vmul.f32 %v1494_v41, %v1382_v40  ;;  %v1433_v47 = vmul.f32 %v1417_v44, %v1369_v60 }
 0x3a0   :  { %v1434_v17 = vmul.f32 %v1418_v45, %v1370_v24  ;;  %1525 = vst [vmem:[%s2757_s9 + $0x50] sm:$0xff] %v1509_v46 }
 0x3a1   :  { %1526 = vst [vmem:[%s2757_s9 + $0x58] sm:$0xff] %v1510_v16  ;;  %v1449_v1 = vadd.f32 %v1433_v47, %v1369_v60 }
 0x3a2   :  { %v1450_v48 = vadd.f32 %v1434_v17, %v1370_v24 }
 0x3a3   :  { %v2097_v2 = vpop.eup %2096  ;;  %v1465_v52 = vmul.f32 0.7978846, %v1449_v1 }
 0x3a4   :  { %v2099_v49 = vpop.eup %2098  ;;  %v1495_v51 = vadd.f32 1.0, %v2097_v2  ;;  %v1466_v53 = vmul.f32 0.7978846, %v1450_v48 }
 0x3a5   :  { %v1496_v54 = vadd.f32 1.0, %v2099_v49  ;;  %2100 = vtanh.f32 %v1465_v52 }
 0x3a6   :  { %v1511_v37 = vmul.f32 %v1495_v51, %v1383_v50  ;;  %2102 = vtanh.f32 %v1466_v53 }
 0x3a7   :  { %v1512_v42 = vmul.f32 %v1496_v54, %v1384_v36 }
 0x3a8   :  { %1527 = vst [vmem:[%s2757_s9 + $0x60] sm:$0xff] %v1511_v37 }
 0x3a9   :  { %1528 = vst [vmem:[%s2757_s9 + $0x68] sm:$0xff] %v1512_v42 }
 0x3ab   :  { %v2101_v43 = vpop.eup %2100 }
 0x3ac   :  { %v2103_v55 = vpop.eup %2102  ;;  %v1497_v57 = vadd.f32 1.0, %v2101_v43 }
 0x3ad   :  { %v1498_v58 = vadd.f32 1.0, %v2103_v55 }
 0x3ae   :  { %v1513_v8 = vmul.f32 %v1497_v57, %v1385_v56 }
 0x3af   :  { %v1514_v59 = vmul.f32 %v1498_v58, %v1386_v7 }
 0x3b0   :  { %1529 = vst [vmem:[%s2757_s9 + $0x70] sm:$0xff] %v1513_v8 }
 0x3b1   :  { %1530 = vst [vmem:[%s2757_s9 + $0x78] sm:$0xff] %v1514_v59 }

</bundles_post_ra>
